<compile_context>
chip_gen: v7x
topology: tpu7x:2x2x1
jax: 0.10.0
libtpu: 0.0.40
codegen_flags: <defaults>
</compile_context>

<pallas_src>
import functools

import jax
import jax.numpy as jnp
from jax.experimental import pallas as pl
from jax.experimental.pallas import tpu as pltpu


def _variance_adaptor_kernel(x_ref, w1_ref, b1_ref, w2_ref, b2_ref,
                             wl_ref, bl_ref, o_ref, *, seq_stride, seq_len):
    """One tile = several whole (time-padded) sequences stacked along rows.

    x_ref : (TM, Hp)      f32   activations (rows = bg * seq_stride)
    w1_ref: (3Hp, 3Hp)    bf16  fused conv1 of all 3 predictors
                                 (K tap-major, N predictor-major)
    b1_ref: (1, 3Hp)      f32
    w2_ref: (3, 3Hp, Hp)  bf16  per-predictor conv2 (K tap-major)
    b2_ref: (3, 1, Hp)    f32
    wl_ref: (3Hp, Hp)     bf16  K-stacked final linears (sum of 3 outputs)
    bl_ref: (1, Hp)       f32   summed linear biases
    """
    x = x_ref[...]                                      # (TM, Hp) f32
    TM, Hp = x.shape

    # Narrow (TM, 1) sequence-boundary masks, broadcast inside the where's.
    row = jax.lax.broadcasted_iota(jnp.int32, (TM, 1), 0) % seq_stride
    first = row == 0
    last = row == seq_len - 1

    def taps(a):
        # Conv1d(k=3, pad=1) LHS: [a[t-1] | a[t] | a[t+1]] along the lane axis.
        # pltpu.roll only accepts non-negative shifts; TM-1 == -1 (mod TM).
        prev = jnp.where(first, 0.0, pltpu.roll(a, shift=1, axis=0))
        nxt = jnp.where(last, 0.0, pltpu.roll(a, shift=TM - 1, axis=0))
        return jnp.concatenate([prev, a, nxt], axis=1)   # (TM, 3*Hp) f32

    # --- conv1, fused across all 3 predictors (shared LHS, N = 3*Hp). ------
    x_taps = taps(x)
    h1_all = jnp.dot(x_taps.astype(jnp.bfloat16), w1_ref[...],
                     preferred_element_type=jnp.float32)
    h1_all = jnp.maximum(h1_all + b1_ref[...], 0.0)      # (TM, 3*Hp) f32

    # --- conv2, per predictor (each has a different LHS). ------------------
    h2_parts = []
    for p in range(3):                                   # static unroll
        h1_p = h1_all[:, p * Hp:(p + 1) * Hp]            # 128-aligned slice
        h2 = jnp.dot(taps(h1_p).astype(jnp.bfloat16), w2_ref[p],
                     preferred_element_type=jnp.float32)
        h2_parts.append(jnp.maximum(h2 + b2_ref[p], 0.0))

    # --- final linears fused as one K-stacked dot + residual add. ----------
    h2_cat = jnp.concatenate(h2_parts, axis=1)           # (TM, 3*Hp) f32
    out = x + jnp.dot(h2_cat.astype(jnp.bfloat16), wl_ref[...],
                      preferred_element_type=jnp.float32) + bl_ref[...]
    o_ref[...] = out.astype(o_ref.dtype)


def variance_adaptor(x, W1, B1, W2, B2, WL, BL, *, rows_per_tile=1024):
    """VarianceAdaptor forward: x + dur(x) + pitch(x) + energy(x).

    x  : (B, T, H)
    W1, W2 : (3, 3, H, H)   (predictor, tap, in, out) conv weights
             (torch Conv1d weight (out,in,k) maps here via transpose(2,1,0))
    B1, B2, BL : (3, H)
    WL : (3, H, H)          (predictor, in, out) linear weight (torch W.T)
    """
    B, T, H = x.shape
    Hp = ((H + 127) // 128) * 128        # lane-dense channel dim
    Tp = ((T + 7) // 8) * 8              # sublane-aligned sequence stride

    # Whole padded sequences per tile: large MXU M, no cross-tile halo, and
    # TM stays bounded.  Lower bg so the grid has >=2 steps when possible
    # (keeps both v7x TensorCores busy through dimension_semantics=parallel).
    bg = min(B, max(1, rows_per_tile // Tp))
    if bg >= B and B >= 2:
        bg = (B + 1) // 2
    Bp = ((B + bg - 1) // bg) * bg
    TM = bg * Tp
    grid = (Bp // bg,)

    f32, bf16 = jnp.float32, jnp.bfloat16

    x_p = jnp.pad(x.astype(f32), ((0, Bp - B), (0, Tp - T), (0, Hp - H)))
    x_flat = x_p.reshape(Bp * Tp, Hp)

    # NOTE: in production the padded / reshaped / bf16 weights below would be
    # precomputed once at parameter-setup time instead of per forward call.
    def pad4(w):                          # (3,3,H,H) -> (3,3,Hp,Hp)
        return jnp.pad(w, ((0, 0), (0, 0), (0, Hp - H), (0, Hp - H)))

    # Fused conv1: rows = tap-major K, cols = predictor-major N.
    w1 = pad4(W1).transpose(1, 2, 0, 3).reshape(3 * Hp, 3 * Hp).astype(bf16)
    b1 = jnp.pad(B1, ((0, 0), (0, Hp - H))).reshape(1, 3 * Hp).astype(f32)
    # Per-predictor conv2, tap-major K.
    w2 = pad4(W2).reshape(3, 3 * Hp, Hp).astype(bf16)
    b2 = jnp.pad(B2, ((0, 0), (0, Hp - H)))[:, None, :].astype(f32)
    # K-stacked final linears (predictor-major K) and summed bias.
    wl = jnp.pad(WL, ((0, 0), (0, Hp - H), (0, Hp - H))).reshape(
        3 * Hp, Hp).astype(bf16)
    bl = jnp.pad(BL.sum(axis=0), (0, Hp - H)).reshape(1, Hp).astype(f32)

    # Explicit scoped-VMEM budget: io tiles (double-buffered), weights
    # (double-buffered), generous headroom for taps/h1/h2 temporaries.
    wbytes = (w1.size + w2.size + wl.size) * 2 + (b1.size + b2.size + bl.size) * 4
    io_bytes = 2 * 2 * TM * Hp * 4
    scratch = 8 * TM * 3 * Hp * 4
    vmem_limit = int(min(64 * 2**20,
                         max(2 * wbytes + io_bytes + scratch + 2 * 2**20,
                             16 * 2**20)))

    const2 = lambda i: (0, 0)
    const3 = lambda i: (0, 0, 0)
    kernel = functools.partial(_variance_adaptor_kernel,
                               seq_stride=Tp, seq_len=T)

    out_flat = pl.pallas_call(
        kernel,
        out_shape=jax.ShapeDtypeStruct((Bp * Tp, Hp), x.dtype),
        grid_spec=pltpu.PrefetchScalarGridSpec(
            num_scalar_prefetch=0,
            grid=grid,
            in_specs=[
                pl.BlockSpec((TM, Hp), lambda i: (i, 0)),        # activations
                pl.BlockSpec((3 * Hp, 3 * Hp), const2),          # w1 fused
                pl.BlockSpec((1, 3 * Hp), const2),               # b1
                pl.BlockSpec((3, 3 * Hp, Hp), const3),           # w2
                pl.BlockSpec((3, 1, Hp), const3),                # b2
                pl.BlockSpec((3 * Hp, Hp), const2),              # wl stacked
                pl.BlockSpec((1, Hp), const2),                   # bl summed
            ],
            out_specs=pl.BlockSpec((TM, Hp), lambda i: (i, 0)),
        ),
        compiler_params=pltpu.CompilerParams(
            dimension_semantics=("parallel",),
            vmem_limit_bytes=vmem_limit),
    )(x_flat, w1, b1, w2, b2, wl, bl)

    return out_flat.reshape(Bp, Tp, Hp)[:B, :T, :H]


def _reference(x, W1, B1, W2, B2, WL, BL):
    """Pure-JAX f32 reference of the same math (channels-last conv1d, pad=1)."""
    def conv(inp, w, b):
        pad = jnp.pad(inp, ((0, 0), (1, 1), (0, 0)))
        y = (jnp.einsum("bti,io->bto", pad[:, :-2], w[0])
             + jnp.einsum("bti,io->bto", pad[:, 1:-1], w[1])
             + jnp.einsum("bti,io->bto", pad[:, 2:], w[2])
             + b)
        return jnp.maximum(y, 0.0)

    def predictor(inp, w1, b1, w2, b2, wl, bl):
        h = conv(inp, w1, b1)
        h = conv(h, w2, b2)
        return jnp.einsum("bti,io->bto", h, wl) + bl

    out = x
    for p in range(3):
        out = out + predictor(x, W1[p], B1[p], W2[p], B2[p], WL[p], BL[p])
    return out


if __name__ == "__main__":
    B, T, H = 2, 8, 32   # batch, seq, hidden_dim

    key = jax.random.PRNGKey(0)
    ks = jax.random.split(key, 7)
    s = 0.1
    x = jax.random.normal(ks[0], (B, T, H), dtype=jnp.float32)
    # Stacked weights for the 3 predictors (duration, pitch, energy).
    W1 = s * jax.random.normal(ks[1], (3, 3, H, H), dtype=jnp.float32)
    B1 = s * jax.random.normal(ks[2], (3, H), dtype=jnp.float32)
    W2 = s * jax.random.normal(ks[3], (3, 3, H, H), dtype=jnp.float32)
    B2 = s * jax.random.normal(ks[4], (3, H), dtype=jnp.float32)
    WL = s * jax.random.normal(ks[5], (3, H, H), dtype=jnp.float32)
    BL = s * jax.random.normal(ks[6], (3, H), dtype=jnp.float32)

    out = variance_adaptor(x, W1, B1, W2, B2, WL, BL)
    out = jax.block_until_ready(out)

    ref = _reference(x, W1, B1, W2, B2, WL, BL)
    assert out.shape == (B, T, H)
    # bf16 MXU operands with f32 accumulation -> tolerance loosened vs the
    # f32 reference; real layout/tap bugs produce O(1) errors at these scales.
    err = float(jnp.max(jnp.abs(out - ref)))
    assert err < 5e-2, f"mismatch vs reference: max abs err = {err}"
    print("KERNEL_OK")
</pallas_src>

<mosaic_0001>
module attributes {stable_mosaic.version = 11 : i64} {
  func.func @_variance_adaptor_kernel(%arg0: i32, %arg1: memref<8x128xf32, #tpu.memory_space<vmem>>, %arg2: memref<384x384xbf16, #tpu.memory_space<vmem>>, %arg3: memref<1x384xf32, #tpu.memory_space<vmem>>, %arg4: memref<3x384x128xbf16, #tpu.memory_space<vmem>>, %arg5: memref<3x1x128xf32, #tpu.memory_space<vmem>>, %arg6: memref<384x128xbf16, #tpu.memory_space<vmem>>, %arg7: memref<1x128xf32, #tpu.memory_space<vmem>>, %arg8: memref<8x128xf32, #tpu.memory_space<vmem>>) attributes {dimension_semantics = [#tpu.dimension_semantics<parallel>], iteration_bounds = array<i64: 2>, scalar_prefetch = 0 : i64, scratch_operands = 0 : i64, tpu.core_type = #tpu.core_type<tc>, window_params = [{transform_indices = @transform_0, window_bounds = array<i64: 8, 128>}, {pipeline_mode = #tpu.pipeline_mode<synchronous>, transform_indices = @transform_1, window_bounds = array<i64: 384, 384>}, {pipeline_mode = #tpu.pipeline_mode<synchronous>, transform_indices = @transform_2, window_bounds = array<i64: 1, 384>}, {pipeline_mode = #tpu.pipeline_mode<synchronous>, transform_indices = @transform_3, window_bounds = array<i64: 3, 384, 128>}, {pipeline_mode = #tpu.pipeline_mode<synchronous>, transform_indices = @transform_4, window_bounds = array<i64: 3, 1, 128>}, {pipeline_mode = #tpu.pipeline_mode<synchronous>, transform_indices = @transform_5, window_bounds = array<i64: 384, 128>}, {pipeline_mode = #tpu.pipeline_mode<synchronous>, transform_indices = @transform_6, window_bounds = array<i64: 1, 128>}, {transform_indices = @transform_7, window_bounds = array<i64: 8, 128>}]} {
    %c0 = arith.constant 0 : index
    %c0_0 = arith.constant 0 : index
    %0 = vector.load %arg1[%c0, %c0_0] : memref<8x128xf32, #tpu.memory_space<vmem>>, vector<8x128xf32>
    %1 = tpu.iota {dimensions = array<i32: 0>} : vector<8x1xi32>
    %c8_i32 = arith.constant 8 : i32
    %c0_i32 = arith.constant 0 : i32
    %2 = arith.cmpi eq, %c8_i32, %c0_i32 : i32
    %c1_i32 = arith.constant 1 : i32
    %3 = arith.select %2, %c1_i32, %c8_i32 : i32
    %4 = vector.broadcast %3 : i32 to vector<8x1xi32>
    %5 = arith.remsi %1, %4 : vector<8x1xi32>
    %c0_i32_1 = arith.constant 0 : i32
    %6 = vector.broadcast %c0_i32_1 : i32 to vector<8x1xi32>
    %7 = arith.cmpi ne, %5, %6 : vector<8x1xi32>
    %c0_i32_2 = arith.constant 0 : i32
    %8 = vector.broadcast %c0_i32_2 : i32 to vector<8x1xi32>
    %9 = arith.cmpi slt, %5, %8 : vector<8x1xi32>
    %c0_i32_3 = arith.constant 0 : i32
    %10 = arith.cmpi slt, %3, %c0_i32_3 : i32
    %11 = vector.broadcast %10 : i1 to vector<8x1xi1>
    %12 = vector.broadcast %11 : vector<8x1xi1> to vector<8x1xi1>
    %13 = arith.xori %9, %12 : vector<8x1xi1>
    %14 = arith.andi %13, %7 : vector<8x1xi1>
    %15 = vector.broadcast %3 : i32 to vector<8x1xi32>
    %16 = arith.addi %5, %15 : vector<8x1xi32>
    %17 = arith.select %14, %16, %5 : vector<8x1xi1>, vector<8x1xi32>
    %c0_i32_4 = arith.constant 0 : i32
    %18 = vector.broadcast %c0_i32_4 : i32 to vector<8x1xi32>
    %19 = arith.cmpi eq, %17, %18 : vector<8x1xi32>
    %c7_i32 = arith.constant 7 : i32
    %20 = vector.broadcast %c7_i32 : i32 to vector<8x1xi32>
    %21 = arith.cmpi eq, %17, %20 : vector<8x1xi32>
    %c1_i32_5 = arith.constant 1 : i32
    %22 = tpu.dynamic_rotate %0 by %c1_i32_5 dim 0 : vector<8x128xf32>, i32 -> vector<8x128xf32>
    %cst = arith.constant 0.000000e+00 : f32
    %23 = vector.shape_cast %19 : vector<8x1xi1> to vector<8x1xi1>
    %24 = vector.broadcast %23 : vector<8x1xi1> to vector<8x128xi1>
    %25 = vector.broadcast %cst : f32 to vector<8x128xf32>
    %26 = arith.select %24, %25, %22 : vector<8x128xi1>, vector<8x128xf32>
    %c7_i32_6 = arith.constant 7 : i32
    %27 = tpu.dynamic_rotate %0 by %c7_i32_6 dim 0 : vector<8x128xf32>, i32 -> vector<8x128xf32>
    %cst_7 = arith.constant 0.000000e+00 : f32
    %28 = vector.shape_cast %21 : vector<8x1xi1> to vector<8x1xi1>
    %29 = vector.broadcast %28 : vector<8x1xi1> to vector<8x128xi1>
    %30 = vector.broadcast %cst_7 : f32 to vector<8x128xf32>
    %31 = arith.select %29, %30, %27 : vector<8x128xi1>, vector<8x128xf32>
    %32 = tpu.concatenate %26, %0, %31 in 1 : vector<8x128xf32>, vector<8x128xf32>, vector<8x128xf32> -> vector<8x384xf32>
    %33 = arith.truncf %32 : vector<8x384xf32> to vector<8x384xbf16>
    %c0_8 = arith.constant 0 : index
    %c0_9 = arith.constant 0 : index
    %34 = vector.load %arg2[%c0_8, %c0_9] : memref<384x384xbf16, #tpu.memory_space<vmem>>, vector<384x384xbf16>
    %cst_10 = arith.constant dense<0.000000e+00> : vector<8x384xf32>
    %35 = tpu.matmul %33, %34, %cst_10 {dimension_numbers = #tpu.dot_dimension_numbers<[1], [0], [0], [1], [0, 0, 1, 1], [], []>} : vector<8x384xbf16>, vector<384x384xbf16>, vector<8x384xf32> -> vector<8x384xf32>
    %c0_11 = arith.constant 0 : index
    %c0_12 = arith.constant 0 : index
    %36 = vector.load %arg3[%c0_11, %c0_12] : memref<1x384xf32, #tpu.memory_space<vmem>>, vector<1x384xf32>
    %37 = vector.broadcast %36 : vector<1x384xf32> to vector<8x384xf32>
    %38 = arith.addf %35, %37 : vector<8x384xf32>
    %cst_13 = arith.constant 0.000000e+00 : f32
    %39 = vector.broadcast %cst_13 : f32 to vector<8x384xf32>
    %40 = arith.maximumf %38, %39 : vector<8x384xf32>
    %41 = vector.extract_strided_slice %40 {offsets = [0, 0], sizes = [8, 128], strides = [1, 1]} : vector<8x384xf32> to vector<8x128xf32>
    %c1_i32_14 = arith.constant 1 : i32
    %42 = tpu.dynamic_rotate %41 by %c1_i32_14 dim 0 : vector<8x128xf32>, i32 -> vector<8x128xf32>
    %cst_15 = arith.constant 0.000000e+00 : f32
    %43 = vector.shape_cast %19 : vector<8x1xi1> to vector<8x1xi1>
    %44 = vector.broadcast %43 : vector<8x1xi1> to vector<8x128xi1>
    %45 = vector.broadcast %cst_15 : f32 to vector<8x128xf32>
    %46 = arith.select %44, %45, %42 : vector<8x128xi1>, vector<8x128xf32>
    %c7_i32_16 = arith.constant 7 : i32
    %47 = tpu.dynamic_rotate %41 by %c7_i32_16 dim 0 : vector<8x128xf32>, i32 -> vector<8x128xf32>
    %cst_17 = arith.constant 0.000000e+00 : f32
    %48 = vector.shape_cast %21 : vector<8x1xi1> to vector<8x1xi1>
    %49 = vector.broadcast %48 : vector<8x1xi1> to vector<8x128xi1>
    %50 = vector.broadcast %cst_17 : f32 to vector<8x128xf32>
    %51 = arith.select %49, %50, %47 : vector<8x128xi1>, vector<8x128xf32>
    %52 = tpu.concatenate %46, %41, %51 in 1 : vector<8x128xf32>, vector<8x128xf32>, vector<8x128xf32> -> vector<8x384xf32>
    %53 = arith.truncf %52 : vector<8x384xf32> to vector<8x384xbf16>
    %c0_18 = arith.constant 0 : index
    %c0_19 = arith.constant 0 : index
    %c0_20 = arith.constant 0 : index
    %54 = vector.load %arg4[%c0_18, %c0_19, %c0_20] : memref<3x384x128xbf16, #tpu.memory_space<vmem>>, vector<1x384x128xbf16>
    %55 = vector.shape_cast %54 : vector<1x384x128xbf16> to vector<384x128xbf16>
    %cst_21 = arith.constant dense<0.000000e+00> : vector<8x128xf32>
    %56 = tpu.matmul %53, %55, %cst_21 {dimension_numbers = #tpu.dot_dimension_numbers<[1], [0], [0], [1], [0, 0, 1, 1], [], []>} : vector<8x384xbf16>, vector<384x128xbf16>, vector<8x128xf32> -> vector<8x128xf32>
    %c0_22 = arith.constant 0 : index
    %c0_23 = arith.constant 0 : index
    %c0_24 = arith.constant 0 : index
    %57 = vector.load %arg5[%c0_22, %c0_23, %c0_24] : memref<3x1x128xf32, #tpu.memory_space<vmem>>, vector<1x1x128xf32>
    %58 = vector.shape_cast %57 : vector<1x1x128xf32> to vector<1x128xf32>
    %59 = vector.broadcast %58 : vector<1x128xf32> to vector<8x128xf32>
    %60 = arith.addf %56, %59 : vector<8x128xf32>
    %cst_25 = arith.constant 0.000000e+00 : f32
    %61 = vector.broadcast %cst_25 : f32 to vector<8x128xf32>
    %62 = arith.maximumf %60, %61 : vector<8x128xf32>
    %63 = vector.extract_strided_slice %40 {offsets = [0, 128], sizes = [8, 128], strides = [1, 1]} : vector<8x384xf32> to vector<8x128xf32>
    %c1_i32_26 = arith.constant 1 : i32
    %64 = tpu.dynamic_rotate %63 by %c1_i32_26 dim 0 : vector<8x128xf32>, i32 -> vector<8x128xf32>
    %cst_27 = arith.constant 0.000000e+00 : f32
    %65 = vector.shape_cast %19 : vector<8x1xi1> to vector<8x1xi1>
    %66 = vector.broadcast %65 : vector<8x1xi1> to vector<8x128xi1>
    %67 = vector.broadcast %cst_27 : f32 to vector<8x128xf32>
    %68 = arith.select %66, %67, %64 : vector<8x128xi1>, vector<8x128xf32>
    %c7_i32_28 = arith.constant 7 : i32
    %69 = tpu.dynamic_rotate %63 by %c7_i32_28 dim 0 : vector<8x128xf32>, i32 -> vector<8x128xf32>
    %cst_29 = arith.constant 0.000000e+00 : f32
    %70 = vector.shape_cast %21 : vector<8x1xi1> to vector<8x1xi1>
    %71 = vector.broadcast %70 : vector<8x1xi1> to vector<8x128xi1>
    %72 = vector.broadcast %cst_29 : f32 to vector<8x128xf32>
    %73 = arith.select %71, %72, %69 : vector<8x128xi1>, vector<8x128xf32>
    %74 = tpu.concatenate %68, %63, %73 in 1 : vector<8x128xf32>, vector<8x128xf32>, vector<8x128xf32> -> vector<8x384xf32>
    %75 = arith.truncf %74 : vector<8x384xf32> to vector<8x384xbf16>
    %c1 = arith.constant 1 : index
    %c0_30 = arith.constant 0 : index
    %c0_31 = arith.constant 0 : index
    %76 = vector.load %arg4[%c1, %c0_30, %c0_31] : memref<3x384x128xbf16, #tpu.memory_space<vmem>>, vector<1x384x128xbf16>
    %77 = vector.shape_cast %76 : vector<1x384x128xbf16> to vector<384x128xbf16>
    %cst_32 = arith.constant dense<0.000000e+00> : vector<8x128xf32>
    %78 = tpu.matmul %75, %77, %cst_32 {dimension_numbers = #tpu.dot_dimension_numbers<[1], [0], [0], [1], [0, 0, 1, 1], [], []>} : vector<8x384xbf16>, vector<384x128xbf16>, vector<8x128xf32> -> vector<8x128xf32>
    %c1_33 = arith.constant 1 : index
    %c0_34 = arith.constant 0 : index
    %c0_35 = arith.constant 0 : index
    %79 = vector.load %arg5[%c1_33, %c0_34, %c0_35] : memref<3x1x128xf32, #tpu.memory_space<vmem>>, vector<1x1x128xf32>
    %80 = vector.shape_cast %79 : vector<1x1x128xf32> to vector<1x128xf32>
    %81 = vector.broadcast %80 : vector<1x128xf32> to vector<8x128xf32>
    %82 = arith.addf %78, %81 : vector<8x128xf32>
    %cst_36 = arith.constant 0.000000e+00 : f32
    %83 = vector.broadcast %cst_36 : f32 to vector<8x128xf32>
    %84 = arith.maximumf %82, %83 : vector<8x128xf32>
    %85 = vector.extract_strided_slice %40 {offsets = [0, 256], sizes = [8, 128], strides = [1, 1]} : vector<8x384xf32> to vector<8x128xf32>
    %c1_i32_37 = arith.constant 1 : i32
    %86 = tpu.dynamic_rotate %85 by %c1_i32_37 dim 0 : vector<8x128xf32>, i32 -> vector<8x128xf32>
    %cst_38 = arith.constant 0.000000e+00 : f32
    %87 = vector.shape_cast %19 : vector<8x1xi1> to vector<8x1xi1>
    %88 = vector.broadcast %87 : vector<8x1xi1> to vector<8x128xi1>
    %89 = vector.broadcast %cst_38 : f32 to vector<8x128xf32>
    %90 = arith.select %88, %89, %86 : vector<8x128xi1>, vector<8x128xf32>
    %c7_i32_39 = arith.constant 7 : i32
    %91 = tpu.dynamic_rotate %85 by %c7_i32_39 dim 0 : vector<8x128xf32>, i32 -> vector<8x128xf32>
    %cst_40 = arith.constant 0.000000e+00 : f32
    %92 = vector.shape_cast %21 : vector<8x1xi1> to vector<8x1xi1>
    %93 = vector.broadcast %92 : vector<8x1xi1> to vector<8x128xi1>
    %94 = vector.broadcast %cst_40 : f32 to vector<8x128xf32>
    %95 = arith.select %93, %94, %91 : vector<8x128xi1>, vector<8x128xf32>
    %96 = tpu.concatenate %90, %85, %95 in 1 : vector<8x128xf32>, vector<8x128xf32>, vector<8x128xf32> -> vector<8x384xf32>
    %97 = arith.truncf %96 : vector<8x384xf32> to vector<8x384xbf16>
    %c2 = arith.constant 2 : index
    %c0_41 = arith.constant 0 : index
    %c0_42 = arith.constant 0 : index
    %98 = vector.load %arg4[%c2, %c0_41, %c0_42] : memref<3x384x128xbf16, #tpu.memory_space<vmem>>, vector<1x384x128xbf16>
    %99 = vector.shape_cast %98 : vector<1x384x128xbf16> to vector<384x128xbf16>
    %cst_43 = arith.constant dense<0.000000e+00> : vector<8x128xf32>
    %100 = tpu.matmul %97, %99, %cst_43 {dimension_numbers = #tpu.dot_dimension_numbers<[1], [0], [0], [1], [0, 0, 1, 1], [], []>} : vector<8x384xbf16>, vector<384x128xbf16>, vector<8x128xf32> -> vector<8x128xf32>
    %c2_44 = arith.constant 2 : index
    %c0_45 = arith.constant 0 : index
    %c0_46 = arith.constant 0 : index
    %101 = vector.load %arg5[%c2_44, %c0_45, %c0_46] : memref<3x1x128xf32, #tpu.memory_space<vmem>>, vector<1x1x128xf32>
    %102 = vector.shape_cast %101 : vector<1x1x128xf32> to vector<1x128xf32>
    %103 = vector.broadcast %102 : vector<1x128xf32> to vector<8x128xf32>
    %104 = arith.addf %100, %103 : vector<8x128xf32>
    %cst_47 = arith.constant 0.000000e+00 : f32
    %105 = vector.broadcast %cst_47 : f32 to vector<8x128xf32>
    %106 = arith.maximumf %104, %105 : vector<8x128xf32>
    %107 = tpu.concatenate %62, %84, %106 in 1 : vector<8x128xf32>, vector<8x128xf32>, vector<8x128xf32> -> vector<8x384xf32>
    %108 = arith.truncf %107 : vector<8x384xf32> to vector<8x384xbf16>
    %c0_48 = arith.constant 0 : index
    %c0_49 = arith.constant 0 : index
    %109 = vector.load %arg6[%c0_48, %c0_49] : memref<384x128xbf16, #tpu.memory_space<vmem>>, vector<384x128xbf16>
    %cst_50 = arith.constant dense<0.000000e+00> : vector<8x128xf32>
    %110 = tpu.matmul %108, %109, %cst_50 {dimension_numbers = #tpu.dot_dimension_numbers<[1], [0], [0], [1], [0, 0, 1, 1], [], []>} : vector<8x384xbf16>, vector<384x128xbf16>, vector<8x128xf32> -> vector<8x128xf32>
    %111 = arith.addf %0, %110 : vector<8x128xf32>
    %c0_51 = arith.constant 0 : index
    %c0_52 = arith.constant 0 : index
    %112 = vector.load %arg7[%c0_51, %c0_52] : memref<1x128xf32, #tpu.memory_space<vmem>>, vector<1x128xf32>
    %113 = vector.broadcast %112 : vector<1x128xf32> to vector<8x128xf32>
    %114 = arith.addf %111, %113 : vector<8x128xf32>
    %c0_53 = arith.constant 0 : index
    %c0_54 = arith.constant 0 : index
    %115 = vector.load %arg8[%c0_53, %c0_54] : memref<8x128xf32, #tpu.memory_space<vmem>>, vector<8x128xf32>
    tpu.vector_store %arg8[%c0_53, %c0_54], %114 {strides = array<i32>} : memref<8x128xf32, #tpu.memory_space<vmem>>, vector<8x128xf32>,
    return
  }
  func.func @transform_0(%arg0: i32) -> (i32, i32) {
    %c0_i32 = arith.constant 0 : i32
    %c0_i32_0 = arith.constant 0 : i32
    return %arg0, %c0_i32 : i32, i32
  }
  func.func @transform_1(%arg0: i32) -> (i32, i32) {
    %c0_i32 = arith.constant 0 : i32
    %c0_i32_0 = arith.constant 0 : i32
    %c0_i32_1 = arith.constant 0 : i32
    return %c0_i32, %c0_i32_0 : i32, i32
  }
  func.func @transform_2(%arg0: i32) -> (i32, i32) {
    %c0_i32 = arith.constant 0 : i32
    %c0_i32_0 = arith.constant 0 : i32
    %c0_i32_1 = arith.constant 0 : i32
    return %c0_i32, %c0_i32_0 : i32, i32
  }
  func.func @transform_3(%arg0: i32) -> (i32, i32, i32) {
    %c0_i32 = arith.constant 0 : i32
    %c0_i32_0 = arith.constant 0 : i32
    %c0_i32_1 = arith.constant 0 : i32
    %c0_i32_2 = arith.constant 0 : i32
    return %c0_i32, %c0_i32_0, %c0_i32_1 : i32, i32, i32
  }
  func.func @transform_4(%arg0: i32) -> (i32, i32, i32) {
    %c0_i32 = arith.constant 0 : i32
    %c0_i32_0 = arith.constant 0 : i32
    %c0_i32_1 = arith.constant 0 : i32
    %c0_i32_2 = arith.constant 0 : i32
    return %c0_i32, %c0_i32_0, %c0_i32_1 : i32, i32, i32
  }
  func.func @transform_5(%arg0: i32) -> (i32, i32) {
    %c0_i32 = arith.constant 0 : i32
    %c0_i32_0 = arith.constant 0 : i32
    %c0_i32_1 = arith.constant 0 : i32
    return %c0_i32, %c0_i32_0 : i32, i32
  }
  func.func @transform_6(%arg0: i32) -> (i32, i32) {
    %c0_i32 = arith.constant 0 : i32
    %c0_i32_0 = arith.constant 0 : i32
    %c0_i32_1 = arith.constant 0 : i32
    return %c0_i32, %c0_i32_0 : i32, i32
  }
  func.func @transform_7(%arg0: i32) -> (i32, i32) {
    %c0_i32 = arith.constant 0 : i32
    %c0_i32_0 = arith.constant 0 : i32
    return %arg0, %c0_i32 : i32, i32
  }
}

</mosaic_0001>

<bundles_post_ra>
// kernel: tpu_custom_call.1
= control target key start
LH: loop header
LB: loop body
LE: loop exit
PB: predicated region body
PF: predicated region fallthrough
CT: control target
= control target key end

     0   :  { %s3702_s0 = inlined_call_operand.hbm [shape: f32[16,128], index: 0, kind: input, shape index: {}]   ;;  %s3703_s1 = inlined_call_operand.hbm [shape: bf16[384,384], index: 1, kind: input, shape index: {}]   ;;  %s3704_s2 = inlined_call_operand.vmem [shape: f32[1,384], index: 2, kind: input, shape index: {}]   ;;  %s3705_s3 = inlined_call_operand.hbm [shape: bf16[3,384,128], index: 3, kind: input, shape index: {}]   ;;  %s3706_s4 = inlined_call_operand.vmem [shape: f32[3,1,128], index: 4, kind: input, shape index: {}]   ;;  %s3707_s5 = inlined_call_operand.hbm [shape: bf16[384,128], index: 5, kind: input, shape index: {}]   ;;  %s3708_s6 = inlined_call_operand.vmem [shape: f32[1,128], index: 6, kind: input, shape index: {}]   ;;  %s3709_s7 = inlined_call_operand.hbm [shape: f32[16,128], index: 7, kind: output, shape index: {}]  }
   0x1   :  { %3714 = sst [smem:[#allocation16_spill]] %s3703_s1 }
   0x2   :  { %12 = vsyncpa [#allocation3], 0 }
   0x3   :  { %14 = vsyncpa [#allocation3 + $0x1], 0 }
   0x4   :  { %15 = vsyncpa [#allocation6], 0 }
   0x5   :  { %16 = vsyncpa [#allocation9], 0 }
   0x6   :  { %17 = vsyncpa [#allocation4], 0 }
   0x7   :  { %19 = vsyncpa [#allocation4 + $0x1], 0  ;;  %s3316_s24 = smov 0   ;;  %s3318_s25 = smov 0  }
   0x8   :  { %s3320_s26 = smov 0   ;;  %s3322_s27 = smov 0  }
   0x9 LB: > { %s3337_s28 = sadd.s32 4294967295, %s3262_s27   ;;  %s2292_s29 = sadd.s32 4294967294, %s3262_s27   ;;  %s3262_s27 = sphi %s3322_s27, %s3743_s27   ;;  %s3258_s26 = sphi %s3320_s26, %s3742_s26   ;;  %s3254_s25 = sphi %s3318_s25, %s3741_s25   ;;  %s3250_s24 = sphi %s3316_s24, %s3740_s24  }
   0xa   : > { %p45_p0 = scmp.ne.s32.totalorder %s3254_s25, %s3250_s24  ;;  %p3710_p1 = scmp.eq.s32.totalorder %s3337_s28, 0 }
   0xb   : > { %p201_p3 = scmp.eq.s32.totalorder %s2292_s29, 1  ;;  %p2293_p5 = scmp.ge.s32.totalorder %s3262_s27, 1 }
   0xc   : > { %p3346_p4 = por %p3710_p1, %p45_p0  ;;  %p208_p7 = scmp.lt.s32.totalorder %s3262_s27, 3 }
   0xd   : > { %p3351_p6 = por %p201_p3, %p45_p0  ;;  %s3264_s10 = smov [#allocation5]  }
   0xe   : > { %s3715_s30 = scalar_select %p3346_p4, 1, 0 }
   0xf   : > { %s3716_s8 = scalar_select %p3351_p6, 1, 0 }
  0x10   : > { %p3356_p8 = pnand %p2293_p5, %p208_p7  ;;  %s220_s11 = sshll.u32 %s3264_s10, 4  ;;  %s3360_s11 = int_to_ptr.vmem [resolvable:$true] %s220_s11 }
  0x11   : > { %3717 = sst [smem:[#allocation15_spill]] %s3716_s8  ;;  %s3265_s13 = smov [#allocation7]  }
  0x12   : > { %s3718_s9 = scalar_select %p3356_p8, 1, 0 }
  0x13   : > { %p2813_p9 = pneg %p3356_p8  ;;  %s236_s14 = sshll.u32 %s3265_s13, 4  ;;  %s3371_s14 = int_to_ptr.vmem [resolvable:$true] %s236_s14 }
  0x14   : > { %s3720_s1 = sld [smem:[#allocation16_spill]] }
  0x15   : > { %p3367_p11 = pnand %p2813_p9, %p3710_p1 }
  0x17   : > { %p3381_p13 = pneg %p3367_p11 }
  0x1a   : > { %s3074_s17 = scalar_lea.hbm %s3720_s1, 9216 }
  0x1b   : > { %p3075_p12 = scmp.ne.s32.totalorder %s3720_s1, %s3074_s17  ;;  %p3081_p5 = scmp.lt.u32.totalorder %s3074_s17, %s3720_s1 }
  0x1d   : > { %p3077_p0 = pnand %p3381_p13, %p3075_p12 }
  0x1f   : > { %p3078_p3 = pneg %p3077_p0 }
  0x21   : > { %p3083_p7 = pnand %p3081_p5, %p3078_p3 }
  0x23   : > { %3086 = shalt.err (!%p3083_p7)
}
  0x24   : > { %s3087_s23 = scalar_lea.vmem %s3360_s11, 9216  ;;  %p3095_p2 = scmp.lt.s32.totalorder %s3360_s11, %s3360_s11 }
  0x25   : > { %p3088_p9 = scmp.ne.s32.totalorder %s3360_s11, %s3087_s23  ;;  %p3096_p6 = scmp.lt.s32.totalorder %s3087_s23, %s3087_s23 }
  0x27   : > { %p3090_p10 = pnand %p3088_p9, %p3381_p13  ;;  %p3097_p12 = por %p3096_p6, %p3095_p2 }
  0x29   : > { %p3091_p1 = pneg %p3090_p10 }
  0x2b   : > { %p3098_p0 = pnand %p3097_p12, %p3091_p1 }
  0x2d   : > { %3101 = shalt.err (!%p3098_p0)
}
  0x2e   : > { %s3266_s29 = smov 192   ;;  %s3267_s10 = smov 12  }
  0x2f   : > { %2816 = dma.hbm_to_vmem [thread:$0]  (!%p3367_p11), %s3720_s1, 9216, %s3360_s11, [#allocation6], %s3266_s29, %s3266_s29, %s3267_s10  }
  0x30   : > { %s3102_s18 = scalar_lea.hbm %s3705_s3, 9216 }
  0x31   : > { %p3103_p2 = scmp.ne.s32.totalorder %s3705_s3, %s3102_s18  ;;  %p3109_p10 = scmp.lt.u32.totalorder %s3102_s18, %s3705_s3 }
  0x33   : > { %p3105_p1 = pnand %p3103_p2, %p3381_p13 }
  0x35   : > { %p3106_p6 = pneg %p3105_p1 }
  0x37   : > { %p3111_p3 = pnand %p3109_p10, %p3106_p6 }
  0x39   : > { %3114 = shalt.err (!%p3111_p3)
}
  0x3a   : > { %s3115_s11 = scalar_lea.vmem %s3371_s14, 9216  ;;  %p3123_p12 = scmp.lt.s32.totalorder %s3371_s14, %s3371_s14 }
  0x3b   : > { %p3116_p5 = scmp.ne.s32.totalorder %s3371_s14, %s3115_s11  ;;  %p3124_p0 = scmp.lt.s32.totalorder %s3115_s11, %s3115_s11 }
  0x3d   : > { %p3118_p7 = pnand %p3116_p5, %p3381_p13  ;;  %p3125_p2 = por %p3124_p0, %p3123_p12 }
  0x3f   : > { %p3119_p9 = pneg %p3118_p7 }
  0x41   : > { %p3126_p1 = pnand %p3125_p2, %p3119_p9 }
  0x43   : > { %3129 = shalt.err (!%p3126_p1)
}
  0x44   : > { %s3268_s29 = smov 64   ;;  %s3269_s10 = smov 4  }
  0x45   : > { %2819 = dma.hbm_to_vmem [thread:$0]  (!%p3367_p11), %s3705_s3, 9216, %s3371_s14, [#allocation6], %s3268_s29, %s3268_s29, %s3269_s10  }
  0x46   : > { %s3270_s16 = smov [#allocation8]   ;;  %s3426_s18 = sadd.s32 1, %s3262_s27  }
  0x47   : > { %s252_s17 = sshll.u32 %s3270_s16, 4  ;;  %s3130_s22 = scalar_lea.hbm %s3707_s5, 3072  ;;  %s253_s17 = int_to_ptr.vmem [resolvable:$true] %s252_s17 }
  0x48   : > { %p3131_p6 = scmp.ne.s32.totalorder %s3707_s5, %s3130_s22  ;;  %p3137_p5 = scmp.lt.u32.totalorder %s3130_s22, %s3707_s5 }
  0x4a   : > { %p3133_p10 = pnand %p3131_p6, %p3381_p13 }
  0x4c   : > { %p3134_p3 = pneg %p3133_p10 }
  0x4e   : > { %p3139_p7 = pnand %p3137_p5, %p3134_p3 }
  0x50   : > { %3142 = shalt.err (!%p3139_p7)
}
  0x51   : > { %s3143_s14 = scalar_lea.vmem %s253_s17, 3072  ;;  %p3151_p2 = scmp.lt.s32.totalorder %s253_s17, %s253_s17 }
  0x52   : > { %p3144_p9 = scmp.ne.s32.totalorder %s253_s17, %s3143_s14  ;;  %p3152_p1 = scmp.lt.s32.totalorder %s3143_s14, %s3143_s14 }
  0x54   : > { %p3146_p12 = pnand %p3144_p9, %p3381_p13  ;;  %p3153_p4 = por %p3152_p1, %p3151_p2 }
  0x56   : > { %p3147_p0 = pneg %p3146_p12 }
  0x58   : > { %p3154_p8 = pnand %p3153_p4, %p3147_p0 }
  0x5a   : > { %3157 = shalt.err (!%p3154_p8)
}
  0x5b   : > { %2822 = dma.hbm_to_vmem [thread:$0]  (!%p3367_p11), %s3707_s5, 3072, %s253_s17, [#allocation9], %s3268_s29, %s3268_s29, %s3269_s10  }
  0x5c   : > { %s29_s1 = ssub.s32 %s3262_s27, %s3426_s18  ;;  %s32_s8 = sadd.s32 1, %s3258_s26 }
  0x5d   : > { %p30_p4 = scmp.eq.s32.totalorder %s29_s1, 0  ;;  %p39_p8 = scmp.ne.s32.totalorder %s3258_s26, %s3254_s25 }
  0x5e   : > { %p40_p13 = scmp.eq.s32.totalorder %s3262_s27, 0  ;;  %p2834_p6 = scmp.lt.s32.totalorder %s3262_s27, 2 }
  0x5f   : > { %s3454_s12 = scalar_select %p30_p4, %s3258_s26, %s32_s8  }
  0x60   : > { %p41_p10 = por %p40_p13, %p39_p8  ;;  %p3722_p3 = scmp.eq.s32.totalorder %s3337_s28, 1 }
  0x61   : > { %s269_s16 = sand.u32 1, %s3258_s26   ;;  %s2299_s19 = sshll.u32 %s3262_s27, 7 }
  0x62   : > { %p3458_p5 = por %p3722_p3, %p39_p8  ;;  %s2298_s21 = sshll.u32 %s269_s16, 3 }
  0x63   : > { %s3467_s29 = scalar_lea.hbm %s3702_s0, %s2299_s19  ;;  %s273_s10 = scalar_lea.vmem [#allocation2], %s2298_s21 }
  0x64   : > { %s280_s17 = sshll.u32 %s273_s10, 4  ;;  %p3469_p11 = pnand %p2834_p6, %p41_p10  ;;  %s3473_s17 = int_to_ptr.vmem [resolvable:$true] %s280_s17 }
  0x65   : > { %s270_s14 = scalar_lea.sflag [#allocation3], %s269_s16  ;;  %s3158_s13 = scalar_lea.hbm %s3467_s29, 128 }
  0x66   : > { %p3159_p7 = scmp.ne.s32.totalorder %s3467_s29, %s3158_s13  ;;  %p3160_p9 = pneg %p3469_p11 }
  0x67   : > { %s3163_s8 = scalar_lea.hbm %s3702_s0, 256  ;;  %p3164_p2 = scmp.lt.u32.totalorder %s3467_s29, %s3702_s0 }
  0x68   : > { %p3161_p12 = pnand %p3160_p9, %p3159_p7  ;;  %p3165_p1 = scmp.lt.u32.totalorder %s3163_s8, %s3158_s13 }
  0x69   : > { %p3167_p8 = scmp.lt.u32.totalorder %s3158_s13, %s3467_s29 }
  0x6a   : > { %p3162_p0 = pneg %p3161_p12  ;;  %p3166_p4 = por %p3165_p1, %p3164_p2 }
  0x6c   : > { %p3168_p13 = por %p3167_p8, %p3166_p4 }
  0x6e   : > { %p3169_p6 = pnand %p3168_p13, %p3162_p0 }
  0x70   : > { %3172 = shalt.err (!%p3169_p6)
}
  0x71   : > { %s3173_s16 = scalar_lea.vmem %s3473_s17, 128  ;;  %s3271_s22 = smov [#allocation2]  }
  0x72   : > { %p3174_p10 = scmp.ne.s32.totalorder %s3473_s17, %s3173_s16  ;;  %s3178_s23 = sshll.u32 %s3271_s22, 4  ;;  %s3179_s23 = int_to_ptr.vmem [resolvable:$false] %s3178_s23 }
  0x73   : > { %s3180_s10 = scalar_lea.vmem %s3179_s23, 256  ;;  %p3181_p12 = scmp.lt.s32.totalorder %s3473_s17, %s3179_s23 }
  0x74   : > { %p3176_p3 = pnand %p3174_p10, %p3160_p9  ;;  %p3182_p2 = scmp.lt.s32.totalorder %s3180_s10, %s3173_s16 }
  0x76   : > { %p3177_p7 = pneg %p3176_p3  ;;  %p3183_p1 = por %p3182_p2, %p3181_p12 }
  0x78   : > { %p3184_p4 = pnand %p3183_p1, %p3177_p7 }
  0x7a   : > { %3187 = shalt.err (!%p3184_p4)
}
  0x7b   : > { %2826 = dma.hbm_to_vmem [thread:$0]  (!%p3469_p11), %s3467_s29, 128, %s3473_s17, %s270_s14  }
  0x7c   : > { %p3725_p0 = scmp.ne.s32.totalorder %s3718_s9, 0 }
  0x7d   : > { %s3503_s13 = sand.u32 (!%p3725_p0), 1, %s3254_s25   ;;  %p3726_p9 = scmp.ne.s32.totalorder (!%p3725_p0), %s3715_s30, 0 }
  0x7e   : > { %289 = sbr.rel (%p3725_p0) target bundleno = 977 (0x3d1), region = 48  ;;  %s2301_s15 = sshll.u32 (!%p3725_p0), %s3503_s13, 3 }
  0x7f   : > { %s292_s1 = scalar_lea.sflag (!%p3725_p0), [#allocation3], %s3503_s13  ;;  %s3509_s8 = scalar_lea.vmem (!%p3725_p0), [#allocation2], %s2301_s15 }
  0x85   : > { %3233 = dma.done.wait (%p3726_p9), %s292_s1, 128  }
  0x86   : > { %3235 = vsyncadd (%p3726_p9), %s292_s1, 4294967168  ;;  %p3727_p11 = scmp.eq.s32.totalorder %s3337_s28, 0 }
  0x88   : > { %3237 = dma.done.wait (%p3727_p11), [#allocation6], 18432   ;;  %p3728_p8 = pmov %p3727_p11 }
  0x8a   : > { %3239 = vsyncadd (%p3728_p8), [#allocation6], 4294948864  ;;  %p3729_p13 = pmov %p3728_p8 }
  0x8b   : > { %p3730_p6 = pmov %p3728_p8 }
  0x8c   : > { %3241 = dma.done.wait (%p3729_p13), [#allocation9], 3072  }
  0x8d   : > { %3243 = vsyncadd (%p3730_p6), [#allocation9], 4294964224  ;;  %v2881_v0 = vld [vmem:[#allocation5 + $0x4] ss:$12 sps:$4 sm:$0xff]   ;;  %v2883_v1 = vld [vmem:[#allocation5] ss:$12 sps:$4 sm:$0xff]   ;;  %v340_v32 = vlaneseq }
  0x8e   : > { %864 = vmatprep.subr.bf16.mxu0 %v2881_v0  ;;  %v2884_v2 = vld [vmem:[#allocation5 + $0x1c] ss:$12 sps:$4 sm:$0xff]   ;;  %v2886_v3 = vld [vmem:[#allocation5 + $0x18] ss:$12 sps:$4 sm:$0xff]   ;;  %v2887_v4 = vld [vmem:[#allocation5 + $0x34] ss:$12 sps:$4 sm:$0xff]  }
  0x8f   : > { %865 = vmatpush1.bf16.msra.mxu0 %v2883_v1  ;;  %v2889_v5 = vld [vmem:[#allocation5 + $0x30] ss:$12 sps:$4 sm:$0xff]   ;;  %v2890_v6 = vld [vmem:[#allocation5 + $0x4c] ss:$12 sps:$4 sm:$0xff]   ;;  %v2892_v7 = vld [vmem:[#allocation5 + $0x48] ss:$12 sps:$4 sm:$0xff]  }
  0x90   : > { %866 = vmatprep.subr.bf16.mxu0 %v2884_v2  ;;  %v2893_v8 = vld [vmem:[#allocation5 + $0x64] ss:$12 sps:$4 sm:$0xff]   ;;  %v2895_v9 = vld [vmem:[#allocation5 + $0x60] ss:$12 sps:$4 sm:$0xff]   ;;  %v2896_v10 = vld [vmem:[#allocation5 + $0x7c] ss:$12 sps:$4 sm:$0xff]  }
  0x91   : > { %v2898_v11 = vld [vmem:[#allocation5 + $0x78] ss:$12 sps:$4 sm:$0xff]   ;;  %v2899_v12 = vld [vmem:[#allocation5 + $0x94] ss:$12 sps:$4 sm:$0xff]   ;;  %v2901_v15 = vld [vmem:[#allocation5 + $0x90] ss:$12 sps:$4 sm:$0xff]  }
  0x92   : > { %v3524_v13 = vld [vmem:[%s3509_s8] sm:$0xff]  ;;  %v2940_v21 = vld [vmem:[#allocation5 + $0xe0] ss:$12 sps:$4 sm:$0xff]   ;;  %v3528_v36 = vshrl.u32 %v340_v32, 7  ;;  %v3272_v56 = vmov 0.0   ;;  %vm3273_vm2 = vmmov 0  }
  0x93   : > { %867 = vmatpush1.bf16.msra.mxu0 %v2886_v3  ;;  %v365_v14 = vpack.c.bf16 %v3524_v13, %v3524_v13  ;;  %v2902_v16 = vld [vmem:[#allocation5 + $0xac] ss:$12 sps:$4 sm:$0xff]   ;;  %v2935_v17 = vld [vmem:[#allocation5 + $0xc8] ss:$12 sps:$4 sm:$0xff]   ;;  %v2905_v20 = vld [vmem:[#allocation5 + $0xc4] ss:$12 sps:$4 sm:$0xff]  }
  0x94   : > { %868 = vmatprep.subr.bf16.mxu0 %v2887_v4  ;;  %v2936_v18 = vld [vmem:[#allocation5 + $0x8] ss:$12 sps:$4 sm:$0xff]   ;;  %2536 = vmatprep.subr.bf16.mxu1 %v2935_v17  ;;  %v2941_v22 = vld [vmem:[#allocation5 + $0x20] ss:$12 sps:$4 sm:$0xff]   ;;  %v2945_v25 = vld [vmem:[#allocation5 + $0xf8] ss:$12 sps:$4 sm:$0xff]  }
  0x95   : > { %896 = vmatprep.mubr.bf16.mxu0 %v365_v14  ;;  %978 = vmatprep.mubr.bf16.mxu1 %v365_v14  ;;  %v2904_v19 = vld [vmem:[#allocation5 + $0xa8] ss:$12 sps:$4 sm:$0xff]   ;;  %v2907_v23 = vld [vmem:[#allocation5 + $0xc0] ss:$12 sps:$4 sm:$0xff]   ;;  %v2946_v26 = vld [vmem:[#allocation5 + $0x38] ss:$12 sps:$4 sm:$0xff]  }
  0x96   : > { %2537 = vmatpush3.bf16.msra.mxu1 %v2936_v18  ;;  %v2908_v24 = vld [vmem:[#allocation5 + $0xdc] ss:$12 sps:$4 sm:$0xff]   ;;  %v2910_v27 = vld [vmem:[#allocation5 + $0xd8] ss:$12 sps:$4 sm:$0xff]   ;;  %v2911_v28 = vld [vmem:[#allocation5 + $0xf4] ss:$12 sps:$4 sm:$0xff]  }
  0x97   : > { %869 = vmatpush1.bf16.msra.mxu0 %v2889_v5  ;;  %2538 = vmatprep.subr.bf16.mxu1 %v2940_v21  ;;  %v2950_v29 = vld [vmem:[#allocation5 + $0x110] ss:$12 sps:$4 sm:$0xff]   ;;  %v2955_v33 = vld [vmem:[#allocation5 + $0x128] ss:$12 sps:$4 sm:$0xff]   ;;  %v2914_v34 = vld [vmem:[#allocation5 + $0x10c] ss:$12 sps:$4 sm:$0xff]  }
  0x98   : > { %870 = vmatprep.subr.bf16.mxu0 %v2890_v6  ;;  %v2951_v30 = vld [vmem:[#allocation5 + $0x50] ss:$12 sps:$4 sm:$0xff]   ;;  %v2956_v35 = vld [vmem:[#allocation5 + $0x68] ss:$12 sps:$4 sm:$0xff]   ;;  %v2960_v37 = vld [vmem:[#allocation5 + $0x140] ss:$12 sps:$4 sm:$0xff]  }
  0x99   : > { %v2913_v31 = vld [vmem:[#allocation5 + $0xf0] ss:$12 sps:$4 sm:$0xff]   ;;  %v2916_v38 = vld [vmem:[#allocation5 + $0x108] ss:$12 sps:$4 sm:$0xff]   ;;  %v2961_v40 = vld [vmem:[#allocation5 + $0x80] ss:$12 sps:$4 sm:$0xff]  }
  0x9a   : > { %2539 = vmatpush3.bf16.msra.mxu1 %v2941_v22  ;;  %v2917_v39 = vld [vmem:[#allocation5 + $0x124] ss:$12 sps:$4 sm:$0xff]   ;;  %v2919_v42 = vld [vmem:[#allocation5 + $0x120] ss:$12 sps:$4 sm:$0xff]   ;;  %v346_v43 = vand.u32 7, %v3528_v36  ;;  %v356_v50 = vrot.slane %v3524_v13, 7 }
  0x9b   : > { %871 = vmatpush1.bf16.msra.mxu0 %v2892_v7  ;;  %2540 = vmatprep.subr.bf16.mxu1 %v2945_v25  ;;  %v2965_v41 = vld [vmem:[#allocation5 + $0x158] ss:$12 sps:$4 sm:$0xff]   ;;  %v2920_v44 = vld [vmem:[#allocation5 + $0x13c] ss:$12 sps:$4 sm:$0xff]   ;;  %v2923_v48 = vld [vmem:[#allocation5 + $0x154] ss:$12 sps:$4 sm:$0xff]  }
  0x9c   : > { %872 = vmatprep.subr.bf16.mxu0 %v2893_v8  ;;  %v2966_v45 = vld [vmem:[#allocation5 + $0x98] ss:$12 sps:$4 sm:$0xff]   ;;  %v2967_v46 = vld [vmem:[#allocation5 + $0x170] ss:$12 sps:$4 sm:$0xff]   ;;  %vm2534_vm0 = vcmp.ne.s32.totalorder %v346_v43, 0  ;;  %v2381_v55 = vpack.c.bf16 %v356_v50, %v356_v50  ;;  %v3274_v1 = vmov 0  }
  0x9d   : > { %v2922_v47 = vld [vmem:[#allocation5 + $0x138] ss:$12 sps:$4 sm:$0xff]   ;;  %v2968_v49 = vld [vmem:[#allocation5 + $0xb0] ss:$12 sps:$4 sm:$0xff]   ;;  %v2969_v53 = vld [vmem:[#allocation5 + $0x188] ss:$12 sps:$4 sm:$0xff]  }
  0x9e   : > { %2541 = vmatpush3.bf16.msra.mxu1 %v2946_v26  ;;  %v2925_v51 = vld [vmem:[#allocation5 + $0x150] ss:$12 sps:$4 sm:$0xff]   ;;  %v2926_v52 = vld [vmem:[#allocation5 + $0x16c] ss:$12 sps:$4 sm:$0xff]   ;;  %v2928_v54 = vld [vmem:[#allocation5 + $0x168] ss:$12 sps:$4 sm:$0xff]  }
  0x9f   : > { %873 = vmatpush1.bf16.msra.mxu0 %v2895_v9  ;;  %2542 = vmatprep.subr.bf16.mxu1 %v2950_v29  ;;  %vm3533_vm1 = vmpackc.low %vm2534_vm0, %vm2534_vm0  ;;  %v2931_v58 = vld [vmem:[#allocation5 + $0x184] ss:$12 sps:$4 sm:$0xff]   ;;  %v2970_v59 = vld [vmem:[#allocation5 + $0x1a0] ss:$12 sps:$4 sm:$0xff]   ;;  %v360_v3 = vrot.slane %v3524_v13, 1  ;;  %vm3547_vm3 = vcmp.ne.s32.totalorder %v346_v43, 7 }
  0xa0   : > { %874 = vmatprep.subr.bf16.mxu0 %v2896_v10  ;;  %v2929_v60 = vld [vmem:[#allocation5 + $0x180] ss:$12 sps:$4 sm:$0xff]   ;;  %v2934_v61 = vld [vmem:[#allocation5 + $0x19c] ss:$12 sps:$4 sm:$0xff]   ;;  %v2971_v62 = vld [vmem:[#allocation5 + $0x1b8] ss:$12 sps:$4 sm:$0xff]  }
  0xa1   : > { %v2932_v63 = vld [vmem:[#allocation5 + $0x198] ss:$12 sps:$4 sm:$0xff]   ;;  %v2939_v0 = vld [vmem:[#allocation5 + $0x1b4] ss:$12 sps:$4 sm:$0xff]   ;;  %v2972_v2 = vld [vmem:[#allocation5 + $0x1d0] ss:$12 sps:$4 sm:$0xff]  }
  0xa2   : > { %2543 = vmatpush3.bf16.msra.mxu1 %v2951_v30  ;;  %v2937_v4 = vld [vmem:[#allocation5 + $0x1b0] ss:$12 sps:$4 sm:$0xff]   ;;  %v2944_v5 = vld [vmem:[#allocation5 + $0x1cc] ss:$12 sps:$4 sm:$0xff]   ;;  %v2973_v7 = vld [vmem:[#allocation5 + $0x1e8] ss:$12 sps:$4 sm:$0xff]  }
  0xa3   : > { %875 = vmatpush1.bf16.msra.mxu0 %v2898_v11  ;;  %2544 = vmatprep.subr.bf16.mxu1 %v2955_v33  ;;  %v2942_v8 = vld [vmem:[#allocation5 + $0x1c8] ss:$12 sps:$4 sm:$0xff]   ;;  %v2949_v9 = vld [vmem:[#allocation5 + $0x1e4] ss:$12 sps:$4 sm:$0xff]   ;;  %v2974_v10 = vld [vmem:[#allocation5 + $0x200] ss:$12 sps:$4 sm:$0xff]  }
  0xa4   : > { %876 = vmatprep.subr.bf16.mxu0 %v2899_v12  ;;  %v2947_v11 = vld [vmem:[#allocation5 + $0x1e0] ss:$12 sps:$4 sm:$0xff]   ;;  %v2954_v12 = vld [vmem:[#allocation5 + $0x1fc] ss:$12 sps:$4 sm:$0xff]   ;;  %v2975_v13 = vld [vmem:[#allocation5 + $0x218] ss:$12 sps:$4 sm:$0xff]  }
  0xa5   : > { %v2952_v14 = vld [vmem:[#allocation5 + $0x1f8] ss:$12 sps:$4 sm:$0xff]   ;;  %vm3557_vm4 = vmpackc.low %vm3547_vm3, %vm3547_vm3  ;;  %v2976_v17 = vld [vmem:[#allocation5 + $0x230] ss:$12 sps:$4 sm:$0xff]   ;;  %s2531_s23 = sshll.u32 %s3337_s28, 7  ;;  %s337_s10 = scalar_lea.vmem [#allocation10], %s2301_s15 }
  0xa6   : > { %2545 = vmatpush3.bf16.msra.mxu1 %v2956_v35  ;;  %v2977_v18 = vld [vmem:[#allocation7 + $0x40] sm:$0xff]   ;;  %v2980_v22 = vld [vmem:[#allocation7 + $0x48] sm:$0xff]   ;;  %v2983_v26 = vld [vmem:[#allocation7 + $0x50] sm:$0xff]   ;;  %s2193_s1 = sshll.u32 %s337_s10, 4  ;;  %s3658_s29 = scalar_lea.hbm %s3709_s7, %s2531_s23  ;;  %s3660_s1 = int_to_ptr.vmem [resolvable:$true] %s2193_s1 }
  0xa7   : > { %877 = vmatpush1.bf16.msra.mxu0 %v2901_v15  ;;  %2546 = vmatprep.subr.bf16.mxu1 %v2960_v37  ;;  %v2959_v15 = vld [vmem:[#allocation5 + $0x214] ss:$12 sps:$4 sm:$0xff]   ;;  %v2981_v25 = vld [vmem:[#allocation7 + $0x8] sm:$0xff]   ;;  %v2986_v29 = vld [vmem:[#allocation7 + $0x58] sm:$0xff]   ;;  %s2180_s17 = scalar_lea.sflag [#allocation4], %s3503_s13  ;;  %s3188_s28 = scalar_lea.vmem %s3660_s1, 128 }
  0xa8   : > { %878 = vmatprep.subr.bf16.mxu0 %v2902_v16  ;;  %v2978_v21 = vld [vmem:[#allocation7] sm:$0xff]   ;;  %v2982_v30 = vld [vmem:[#allocation7 + $0x88] sm:$0xff]   ;;  %v2985_v33 = vld [vmem:[#allocation7 + $0x90] sm:$0xff]   ;;  %p3189_p10 = scmp.ne.s32.totalorder %s3660_s1, %s3188_s28  ;;  %s3275_s15 = smov [#allocation10]  }
  0xa9   : > { %v2989_v32 = vld [vmem:[#allocation7 + $0x60] sm:$0xff]   ;;  %v2992_v35 = vld [vmem:[#allocation7 + $0x68] sm:$0xff]   ;;  %v2988_v37 = vld [vmem:[#allocation7 + $0x98] sm:$0xff]  }
  0xaa   : > { %2547 = vmatpush3.bf16.msra.mxu1 %v2961_v40  ;;  %v2994_v40 = vld [vmem:[#allocation7 + $0xa8] sm:$0xff]   ;;  %v2997_v43 = vld [vmem:[#allocation7 + $0xb0] sm:$0xff]   ;;  %v3056_v57 = vld [vmem:[#allocation8 + $0x18] sm:$0xff]   ;;  %p3190_p3 = pnand %p3189_p10, %p3458_p5 }
  0xab   : > { %879 = vmatpush1.bf16.msra.mxu0 %v2904_v19  ;;  %2548 = vmatprep.subr.bf16.mxu1 %v2965_v41  ;;  %v2957_v19 = vld [vmem:[#allocation5 + $0x210] ss:$12 sps:$4 sm:$0xff]   ;;  %v3057_v16 = vld [vmem:[#allocation8 + $0x60] sm:$0xff]  }
  0xac   : > { %880 = vmatprep.subr.bf16.mxu0 %v2905_v20  ;;  %v2964_v20 = vld [vmem:[#allocation5 + $0x22c] ss:$12 sps:$4 sm:$0xff]   ;;  %v2995_v41 = vld [vmem:[#allocation7 + $0x70] sm:$0xff]   ;;  %p3191_p7 = pneg %p3190_p3 }
  0xae   : > { %2549 = vmatpush3.bf16.msra.mxu1 %v2966_v45  ;;  %v2999_v45 = vld [vmem:[#allocation7 + $0x38] sm:$0xff]  }
  0xaf   : > { %881 = vmatpush1.bf16.msra.mxu0 %v2907_v23  ;;  %2550 = vmatprep.subr.bf16.mxu1 %v2967_v46  ;;  %v2386_v23 = vpack.c.bf16 %v360_v3, %v360_v3  ;;  %v3000_v46 = vld [vmem:[#allocation7 + $0xb8] sm:$0xff]  }
  0xb0   : > { %882 = vmatprep.subr.bf16.mxu0 %v2908_v24  ;;  %v2962_v24 = vld [vmem:[#allocation5 + $0x228] ss:$12 sps:$4 sm:$0xff]  }
  0xb2   : > { %2551 = vmatpush3.bf16.msra.mxu1 %v2968_v49 }
  0xb3   : > { %883 = vmatpush1.bf16.msra.mxu0 %v2910_v27  ;;  %2691 = vmatprep.subr.bf16.mxu1 %v3272_v56  ;;  %v2979_v27 = vld [vmem:[#allocation7 + $0x80] sm:$0xff]  }
  0xb4   : > { %884 = vmatprep.subr.bf16.mxu0 %v2911_v28  ;;  %v2984_v28 = vld [vmem:[#allocation7 + $0x10] sm:$0xff]  }
  0xb5   : > { %2392 = vmatmul.mubr.msk.bf16.vlgmr.msra.gmra.mrb[0].mxu1 %vm3533_vm1, %v2381_v55 }
  0xb6   : > { %2692 = vmatpush3.bf16.msra.mxu1 %v2969_v53  ;;  %2707 = vmatprep.mubr.msk.bf16.mxu1 %vm3273_vm2, %v3272_v56  ;;  %v475_v53 = vsub.s32 2, %v3528_v36 }
  0xb7   : > { %885 = vmatpush1.bf16.msra.mxu0 %v2913_v31  ;;  %2693 = vmatprep.subr.bf16.mxu1 %v3272_v56  ;;  %v2987_v31 = vld [vmem:[#allocation7 + $0x18] sm:$0xff]  }
  0xb8   : > { %886 = vmatprep.subr.bf16.mxu0 %v2914_v34  ;;  %v2990_v34 = vld [vmem:[#allocation7 + $0x20] sm:$0xff]  }
  0xba   : > { %2694 = vmatpush3.bf16.msra.mxu1 %v2970_v59  ;;  %v467_v59 = vsub.s32 0, %v3528_v36 }
  0xbb   : > { %887 = vmatpush1.bf16.msra.mxu0 %v2916_v38  ;;  %2695 = vmatprep.subr.bf16.mxu1 %v3272_v56  ;;  %v2993_v38 = vld [vmem:[#allocation7 + $0x28] sm:$0xff]  }
  0xbc   : > { %888 = vmatprep.subr.bf16.mxu0 %v2917_v39  ;;  %v2991_v39 = vld [vmem:[#allocation7 + $0xa0] sm:$0xff]  }
  0xbe   : > { %2696 = vmatpush3.bf16.msra.mxu1 %v2971_v62 }
  0xbf   : > { %889 = vmatpush1.bf16.msra.mxu0 %v2919_v42  ;;  %2697 = vmatprep.subr.bf16.mxu1 %v3272_v56  ;;  %v2996_v42 = vld [vmem:[#allocation7 + $0x30] sm:$0xff]  }
  0xc0   : > { %890 = vmatprep.subr.bf16.mxu0 %v2920_v44  ;;  %v2998_v44 = vld [vmem:[#allocation7 + $0x78] sm:$0xff]  }
  0xc2   : > { %2698 = vmatpush3.bf16.msra.mxu1 %v2972_v2 }
  0xc3   : > { %891 = vmatpush1.bf16.msra.mxu0 %v2922_v47  ;;  %2699 = vmatprep.subr.bf16.mxu1 %v3272_v56  ;;  %v3001_v47 = vld [vmem:[#allocation7 + $0x100] sm:$0xff]  }
  0xc4   : > { %892 = vmatprep.subr.bf16.mxu0 %v2923_v48 }
  0xc6   : > { %2700 = vmatpush3.bf16.msra.mxu1 %v2973_v7 }
  0xc7   : > { %893 = vmatpush1.bf16.msra.mxu0 %v2925_v51  ;;  %2701 = vmatprep.subr.bf16.mxu1 %v3272_v56 }
  0xc8   : > { %894 = vmatprep.subr.bf16.mxu0 %v2926_v52 }
  0xca   : > { %2702 = vmatpush3.bf16.msra.mxu1 %v2974_v10 }
  0xcb   : > { %895 = vmatpush1.bf16.msra.mxu0 %v2928_v54  ;;  %2703 = vmatprep.subr.bf16.mxu1 %v3272_v56  ;;  %v463_v54 = vld [vmem:[%s3704_s2] sm:$0x7] }
  0xcc   : > { %905 = vmatprep.subr.bf16.mxu0 %v2931_v58  ;;  %v468_v2 = vrot.slane %v463_v54, %v467_v59  ;;  %v3034_v59 = vld [vmem:[#allocation7 + $0x1d8] sm:$0xff]  }
  0xce   : > { %2382 = vmatmul.mubr.msk.bf16.vlgmr.msra.gmra.mrb[0].mxu0 %vm3533_vm1, %v2381_v55  ;;  %2704 = vmatpush3.bf16.msra.mxu1 %v2975_v13  ;;  %v476_v55 = vrot.slane %v463_v54, %v475_v53  ;;  %v3030_v53 = vld [vmem:[#allocation7 + $0x208] sm:$0xff]  }
  0xcf   : > { %906 = vmatpush1.bf16.msra.mxu0 %v2929_v60  ;;  %937 = vmatprep.mubr.bf16.mxu0 %v3274_v1 }
  0xd0   : > { %907 = vmatprep.subr.bf16.mxu0 %v2934_v61  ;;  %2705 = vmatprep.subr.bf16.mxu1 %v3272_v56  ;;  %v471_v61 = vsub.s32 1, %v3528_v36  ;;  %v3002_v36 = vld [vmem:[#allocation7 + $0xc0] sm:$0xff]  }
  0xd2   : > { %2706 = vmatpush3.bf16.msra.mxu1 %v2976_v17  ;;  %v472_v3 = vrot.slane %v463_v54, %v471_v61  ;;  %v3031_v54 = vld [vmem:[#allocation7 + $0x1d0] sm:$0xff]   ;;  %v3036_v61 = vld [vmem:[#allocation7 + $0x218] sm:$0xff]  }
  0xd3   : > { %908 = vmatpush1.bf16.msra.mxu0 %v2932_v63  ;;  %2567 = vmatprep.subr.bf16.mxu1 %v2977_v18 }
  0xd4   : > { %909 = vmatprep.subr.bf16.mxu0 %v2939_v0 }
  0xd5   : > { %2708 = vmatmul.mubr.msk.bf16.vlgmr.msra.gmra.mrb[4].mxu1 %vm3557_vm4, %v2386_v23 }
  0xd6   : > { %2568 = vmatpush3.bf16.msra.mxu1 %v2978_v21  ;;  %v3005_v21 = vld [vmem:[#allocation7 + $0xc8] sm:$0xff]  }
  0xd7   : > { %910 = vmatpush1.bf16.msra.mxu0 %v2937_v4  ;;  %2569 = vmatprep.subr.bf16.mxu1 %v2980_v22  ;;  %v3006_v22 = vld [vmem:[#allocation7 + $0x148] sm:$0xff]  }
  0xd8   : > { %911 = vmatprep.subr.bf16.mxu0 %v2944_v5 }
  0xda   : > { %2570 = vmatpush3.bf16.msra.mxu1 %v2981_v25  ;;  %v3009_v25 = vld [vmem:[#allocation7 + $0x150] sm:$0xff]  }
  0xdb   : > { %912 = vmatpush1.bf16.msra.mxu0 %v2942_v8  ;;  %2571 = vmatprep.subr.bf16.mxu1 %v2983_v26  ;;  %v3010_v26 = vld [vmem:[#allocation7 + $0x118] sm:$0xff]  }
  0xdc   : > { %913 = vmatprep.subr.bf16.mxu0 %v2949_v9 }
  0xde   : > { %2572 = vmatpush3.bf16.msra.mxu1 %v2984_v28  ;;  %v3012_v28 = vld [vmem:[#allocation7 + $0x158] sm:$0xff]  }
  0xdf   : > { %914 = vmatpush1.bf16.msra.mxu0 %v2947_v11  ;;  %2573 = vmatprep.subr.bf16.mxu1 %v2986_v29  ;;  %v3013_v29 = vld [vmem:[#allocation7 + $0x120] sm:$0xff]  }
  0xe0   : > { %915 = vmatprep.subr.bf16.mxu0 %v2954_v12 }
  0xe2   : > { %2574 = vmatpush3.bf16.msra.mxu1 %v2987_v31  ;;  %v3015_v31 = vld [vmem:[#allocation7 + $0x160] sm:$0xff]  }
  0xe3   : > { %916 = vmatpush1.bf16.msra.mxu0 %v2952_v14  ;;  %2575 = vmatprep.subr.bf16.mxu1 %v2989_v32  ;;  %v3016_v32 = vld [vmem:[#allocation7 + $0x128] sm:$0xff]  }
  0xe4   : > { %917 = vmatprep.subr.bf16.mxu0 %v2959_v15  ;;  %v3003_v15 = vld [vmem:[#allocation7 + $0x140] sm:$0xff]  }
  0xe6   : > { %2576 = vmatpush3.bf16.msra.mxu1 %v2990_v34  ;;  %v3018_v34 = vld [vmem:[#allocation7 + $0x168] sm:$0xff]  }
  0xe7   : > { %918 = vmatpush1.bf16.msra.mxu0 %v2957_v19  ;;  %2577 = vmatprep.subr.bf16.mxu1 %v2992_v35  ;;  %v3004_v19 = vld [vmem:[#allocation7 + $0x108] sm:$0xff]   ;;  %v3019_v35 = vld [vmem:[#allocation7 + $0x130] sm:$0xff]  }
  0xe8   : > { %919 = vmatprep.subr.bf16.mxu0 %v2964_v20 }
  0xea   : > { %2578 = vmatpush3.bf16.msra.mxu1 %v2993_v38  ;;  %v3021_v38 = vld [vmem:[#allocation7 + $0x170] sm:$0xff]  }
  0xeb   : > { %920 = vmatpush1.bf16.msra.mxu0 %v2962_v24  ;;  %2579 = vmatprep.subr.bf16.mxu1 %v2995_v41  ;;  %v3008_v24 = vld [vmem:[#allocation7 + $0xd0] sm:$0xff]   ;;  %v3024_v41 = vld [vmem:[#allocation7 + $0x178] sm:$0xff]  }
  0xec   : > { %2711 = vmatprep.subr.bf16.mxu0 %v3272_v56 }
  0xee   : > { %2387 = vmatmul.mubr.msk.bf16.vlgmr.msra.gmra.mrb[0].mxu0 %vm3557_vm4, %v2386_v23  ;;  %2580 = vmatpush3.bf16.msra.mxu1 %v2996_v42  ;;  %v3007_v23 = vld [vmem:[#allocation7 + $0x110] sm:$0xff]  }
  0xef   : > { %2712 = vmatpush3.bf16.msra.mxu0 %v2979_v27  ;;  %2727 = vmatprep.mubr.msk.bf16.mxu0 %vm3273_vm2, %v3272_v56  ;;  %v3011_v27 = vld [vmem:[#allocation7 + $0xd8] sm:$0xff]  }
  0xf0   : > { %2713 = vmatprep.subr.bf16.mxu0 %v3272_v56  ;;  %2581 = vmatprep.subr.bf16.mxu1 %v2998_v44 }
  0xf2   : > { %2582 = vmatpush3.bf16.msra.mxu1 %v2999_v45  ;;  %v3025_v45 = vld [vmem:[#allocation7 + $0x1c0] sm:$0xff]  }
  0xf3   : > { %2714 = vmatpush3.bf16.msra.mxu0 %v2982_v30  ;;  %2598 = vmatprep.subr.bf16.mxu1 %v3001_v47  ;;  %v3014_v30 = vld [vmem:[#allocation7 + $0xe0] sm:$0xff]  }
  0xf4   : > { %2715 = vmatprep.subr.bf16.mxu0 %v3272_v56  ;;  %v3027_v47 = vld [vmem:[#allocation7 + $0x200] sm:$0xff]  }
  0xf7   : > { %2716 = vmatpush3.bf16.msra.mxu0 %v2985_v33  ;;  %v3017_v33 = vld [vmem:[#allocation7 + $0xe8] sm:$0xff]  }
  0xf8   : > { %2717 = vmatprep.subr.bf16.mxu0 %v3272_v56 }
  0xfb   : > { %2718 = vmatpush3.bf16.msra.mxu0 %v2988_v37  ;;  %v3020_v37 = vld [vmem:[#allocation7 + $0xf0] sm:$0xff]  }
  0xfc   : > { %2719 = vmatprep.subr.bf16.mxu0 %v3272_v56 }
  0xff   : > { %2720 = vmatpush3.bf16.msra.mxu0 %v2991_v39  ;;  %v3022_v39 = vld [vmem:[#allocation7 + $0x138] sm:$0xff]  }
 0x100   : > { %2721 = vmatprep.subr.bf16.mxu0 %v3272_v56 }
 0x103   : > { %2722 = vmatpush3.bf16.msra.mxu0 %v2994_v40  ;;  %v3023_v40 = vld [vmem:[#allocation7 + $0xf8] sm:$0xff]  }
 0x104   : > { %2723 = vmatprep.subr.bf16.mxu0 %v3272_v56 }
 0x107   : > { %2724 = vmatpush3.bf16.msra.mxu0 %v2997_v43 }
 0x108   : > { %2725 = vmatprep.subr.bf16.mxu0 %v3272_v56 }
 0x10b   : > { %2726 = vmatpush3.bf16.msra.mxu0 %v3000_v46  ;;  %v3026_v46 = vld [vmem:[#allocation7 + $0x180] sm:$0xff]  }
 0x10c   : > { %2731 = vmatprep.subr.bf16.mxu0 %v3272_v56 }
 0x188   : > { %v2552_v48 = vpop.f32.mrb[0].mxu1 }
 0x189   : > { %v2553_v49 = vpop.f32.mrb[1].mxu1 }
 0x18a   : > { %v2554_v50 = vadd.f32 %v2553_v49, %v2552_v48  ;;  %v2555_v51 = vpop.f32.mrb[2].mxu1 }
 0x18b   : > { %v2556_v52 = vpop.f32.mrb[3].mxu1  ;;  %v3028_v51 = vld [vmem:[#allocation7 + $0x1c8] sm:$0xff]  }
 0x18c   : > { %v981_v58 = vadd.f32 %v2554_v50, %v476_v55  ;;  %v3029_v52 = vld [vmem:[#allocation7 + $0x188] sm:$0xff]   ;;  %v3032_v55 = vld [vmem:[#allocation7 + $0x190] sm:$0xff]  }
 0x1a8   : > { %v1020_v60 = vpop.f32.mrb[4].mxu1 }
 0x1a9   : > { %v3583_v62 = vadd.f32 %v1020_v60, %v981_v58  ;;  %v2709_v63 = vpop.f32.mrb[5].mxu1  ;;  %v3033_v58 = vld [vmem:[#allocation7 + $0x210] sm:$0xff]   ;;  %v3035_v60 = vld [vmem:[#allocation7 + $0x198] sm:$0xff]  }
 0x1aa   : > { %v1023_v0 = vpop.f32.mrb[6].mxu1  ;;  %v3038_v63 = vld [vmem:[#allocation7 + $0x1a0] sm:$0xff]  }
 0x1ab   : > { %v2710_v1 = vpop.f32.mrb[7].mxu1  ;;  %v3604_v44 = vmax.f32 %v3583_v62, 0.0  ;;  %v3037_v62 = vld [vmem:[#allocation7 + $0x1e0] sm:$0xff]  }
 0x1ac   : > { %v3039_v0 = vld [vmem:[#allocation7 + $0x220] sm:$0xff]   ;;  %v3040_v1 = vld [vmem:[#allocation7 + $0x1e8] sm:$0xff]  }
 0x1ad   : > { %v1610_v50 = vpack.c.bf16 %v3604_v44, %v3604_v44 }
 0x1c1   : > { %v939_v4 = vpop.f32.mrb[0].mxu0 }
 0x1c2   : > { %v2791_v5 = vadd.f32 %v939_v4, %v468_v2  ;;  %v941_v6 = vpop.f32.mrb[1].mxu0  ;;  %v3041_v2 = vld [vmem:[#allocation7 + $0x1a8] sm:$0xff]   ;;  %v3043_v4 = vld [vmem:[#allocation7 + $0x1f0] sm:$0xff]  }
 0x1c3   : > { %v2792_v7 = vadd.f32 %v941_v6, %v472_v3  ;;  %v943_v8 = vpop.f32.mrb[2].mxu0  ;;  %v3042_v3 = vld [vmem:[#allocation7 + $0x228] sm:$0xff]   ;;  %v3045_v6 = vld [vmem:[#allocation7 + $0x230] sm:$0xff]  }
 0x1c4   : > { %v1026_v9 = vmax.f32 %v2791_v5, 0.0  ;;  %v944_v10 = vpop.f32.mrb[3].mxu0  ;;  %v3044_v5 = vld [vmem:[#allocation7 + $0x1b0] sm:$0xff]   ;;  %v3047_v8 = vld [vmem:[#allocation7 + $0x1b8] sm:$0xff]  }
 0x1c5   : > { %v3585_v13 = vmax.f32 %v2792_v7, 0.0  ;;  %v3046_v7 = vld [vmem:[#allocation7 + $0x1f8] sm:$0xff]   ;;  %v1605_v10 = vrot.slane %v3604_v44, 7 }
 0x1c6   : > { %v1029_v11 = vrot.slane %v1026_v9, 7  ;;  %v1031_v12 = vrot.slane %v1026_v9, 1  ;;  %v1034_v14 = vpack.c.bf16 %v1026_v9, %v1026_v9  ;;  %v3048_v9 = vld [vmem:[#allocation7 + $0x238] sm:$0xff]  }
 0x1c7   : > { %v1321_v20 = vpack.c.bf16 %v3585_v13, %v3585_v13  ;;  %v1316_v42 = vrot.slane %v3585_v13, 7  ;;  %v1318_v43 = vrot.slane %v3585_v13, 1 }
 0x1c8   : > { %v2426_v17 = vpack.c.bf16 %v1029_v11, %v1029_v11  ;;  %v2431_v18 = vpack.c.bf16 %v1031_v12, %v1031_v12  ;;  %1267 = vmatprep.mubr.bf16.mxu1 %v1034_v14  ;;  %v1607_v11 = vrot.slane %v3604_v44, 1  ;;  %v2498_v12 = vpack.c.bf16 %v1605_v10, %v1605_v10  ;;  %v3049_v14 = vld [vmem:[#allocation8 + $0x40] sm:$0xff]  }
 0x1c9   : > { %v2462_v48 = vpack.c.bf16 %v1316_v42, %v1316_v42  ;;  %v2467_v49 = vpack.c.bf16 %v1318_v43, %v1318_v43 }
 0x1ca   : > { %2427 = vmatmul.mubr.msk.bf16.vlgmr.msra.gmra.mrb[8].mxu1 %vm3533_vm1, %v2426_v17  ;;  %2728 = vmatmul.mubr.msk.bf16.vlgmr.msra.gmra.mrb[4].mxu0 %vm3557_vm4, %v2431_v18  ;;  %v2503_v13 = vpack.c.bf16 %v1607_v11, %v1607_v11  ;;  %v3052_v17 = vld [vmem:[#allocation8 + $0x8] sm:$0xff]   ;;  %v3053_v18 = vld [vmem:[#allocation8 + $0x50] sm:$0xff]  }
 0x1cb   : > { %2599 = vmatpush3.bf16.msra.mxu1 %v3002_v36  ;;  %2732 = vmatpush3.bf16.msra.mxu0 %v3003_v15  ;;  %v3050_v36 = vld [vmem:[#allocation8] sm:$0xff]   ;;  %v3051_v15 = vld [vmem:[#allocation8 + $0x48] sm:$0xff]  }
 0x1cc   : > { %1556 = vmatprep.mubr.bf16.mxu1 %v1321_v20  ;;  %2600 = vmatprep.subr.bf16.mxu1 %v3004_v19  ;;  %v3054_v19 = vld [vmem:[#allocation8 + $0x10] sm:$0xff]   ;;  %v3055_v20 = vld [vmem:[#allocation8 + $0x58] sm:$0xff]  }
 0x1cd   : > { %2733 = vmatprep.subr.bf16.mxu0 %v3272_v56  ;;  %2747 = vmatprep.mubr.msk.bf16.mxu0 %vm3273_vm2, %v3272_v56 }
 0x1cf   : > { %2601 = vmatpush3.bf16.msra.mxu1 %v3005_v21  ;;  %2734 = vmatpush3.bf16.msra.mxu0 %v3006_v22  ;;  %v3058_v21 = vld [vmem:[#allocation8 + $0x20] sm:$0xff]   ;;  %v3059_v22 = vld [vmem:[#allocation8 + $0x68] sm:$0xff]  }
 0x1d0   : > { %2602 = vmatprep.subr.bf16.mxu1 %v3007_v23  ;;  %2735 = vmatprep.subr.bf16.mxu0 %v3272_v56  ;;  %v3060_v23 = vld [vmem:[#allocation8 + $0x28] sm:$0xff]  }
 0x1d3   : > { %2603 = vmatpush3.bf16.msra.mxu1 %v3008_v24  ;;  %2736 = vmatpush3.bf16.msra.mxu0 %v3009_v25  ;;  %v3061_v24 = vld [vmem:[#allocation8 + $0x70] sm:$0xff]  }
 0x1d4   : > { %2604 = vmatprep.subr.bf16.mxu1 %v3010_v26  ;;  %2737 = vmatprep.subr.bf16.mxu0 %v3272_v56  ;;  %v3062_v25 = vld [vmem:[#allocation8 + $0x30] sm:$0xff]   ;;  %v3063_v26 = vld [vmem:[#allocation8 + $0x78] sm:$0xff]  }
 0x1d7   : > { %2605 = vmatpush3.bf16.msra.mxu1 %v3011_v27  ;;  %2738 = vmatpush3.bf16.msra.mxu0 %v3012_v28  ;;  %v3064_v27 = vld [vmem:[#allocation8 + $0x38] sm:$0xff]   ;;  %v3065_v28 = vld [vmem:[#allocation8 + $0x80] sm:$0xff]  }
 0x1d8   : > { %2606 = vmatprep.subr.bf16.mxu1 %v3013_v29  ;;  %2739 = vmatprep.subr.bf16.mxu0 %v3272_v56  ;;  %v3066_v29 = vld [vmem:[#allocation8 + $0x88] sm:$0xff]  }
 0x1db   : > { %2607 = vmatpush3.bf16.msra.mxu1 %v3014_v30  ;;  %2740 = vmatpush3.bf16.msra.mxu0 %v3015_v31  ;;  %v3067_v30 = vld [vmem:[#allocation8 + $0x90] sm:$0xff]   ;;  %v3068_v31 = vld [vmem:[#allocation8 + $0x98] sm:$0xff]  }
 0x1dc   : > { %2608 = vmatprep.subr.bf16.mxu1 %v3016_v32  ;;  %2741 = vmatprep.subr.bf16.mxu0 %v3272_v56  ;;  %v3069_v32 = vld [vmem:[#allocation8 + $0xa0] sm:$0xff]  }
 0x1df   : > { %2609 = vmatpush3.bf16.msra.mxu1 %v3017_v33  ;;  %2742 = vmatpush3.bf16.msra.mxu0 %v3018_v34  ;;  %v3070_v33 = vld [vmem:[#allocation8 + $0xa8] sm:$0xff]   ;;  %v3071_v34 = vld [vmem:[#allocation8 + $0xb0] sm:$0xff]  }
 0x1e0   : > { %2610 = vmatprep.subr.bf16.mxu1 %v3019_v35  ;;  %2743 = vmatprep.subr.bf16.mxu0 %v3272_v56  ;;  %v3072_v35 = vld [vmem:[#allocation8 + $0xb8] sm:$0xff]  }
 0x1e3   : > { %2611 = vmatpush3.bf16.msra.mxu1 %v3020_v37  ;;  %2744 = vmatpush3.bf16.msra.mxu0 %v3021_v38 }
 0x1e4   : > { %2612 = vmatprep.subr.bf16.mxu1 %v3022_v39  ;;  %2745 = vmatprep.subr.bf16.mxu0 %v3272_v56  ;;  %v2398_v39 = vld [vmem:[%s3706_s4] ss:$0 sm:$0xff] }
 0x1e7   : > { %2613 = vmatpush3.bf16.msra.mxu1 %v3023_v40  ;;  %2746 = vmatpush3.bf16.msra.mxu0 %v3024_v41 }
 0x1e8   : > { %2629 = vmatprep.subr.bf16.mxu1 %v3025_v45  ;;  %2751 = vmatprep.subr.bf16.mxu0 %v3272_v56 }
 0x1ea   : > { %2463 = vmatmul.mubr.msk.bf16.vlgmr.msra.gmra.mrb[12].mxu1 %vm3533_vm1, %v2462_v48  ;;  %2748 = vmatmul.mubr.msk.bf16.vlgmr.msra.gmra.mrb[8].mxu0 %vm3557_vm4, %v2467_v49 }
 0x1eb   : > { %2630 = vmatpush3.bf16.msra.mxu1 %v3026_v46  ;;  %2752 = vmatpush3.bf16.msra.mxu0 %v3027_v47 }
 0x1ec   : > { %1845 = vmatprep.mubr.bf16.mxu1 %v1610_v50  ;;  %2631 = vmatprep.subr.bf16.mxu1 %v3028_v51 }
 0x1ed   : > { %2753 = vmatprep.subr.bf16.mxu0 %v3272_v56  ;;  %2767 = vmatprep.mubr.msk.bf16.mxu0 %vm3273_vm2, %v3272_v56 }
 0x1ef   : > { %2632 = vmatpush3.bf16.msra.mxu1 %v3029_v52  ;;  %2754 = vmatpush3.bf16.msra.mxu0 %v3030_v53 }
 0x1f0   : > { %2633 = vmatprep.subr.bf16.mxu1 %v3031_v54  ;;  %2755 = vmatprep.subr.bf16.mxu0 %v3272_v56 }
 0x1f3   : > { %2634 = vmatpush3.bf16.msra.mxu1 %v3032_v55  ;;  %2756 = vmatpush3.bf16.msra.mxu0 %v3033_v58 }
 0x1f4   : > { %2635 = vmatprep.subr.bf16.mxu1 %v3034_v59  ;;  %2757 = vmatprep.subr.bf16.mxu0 %v3272_v56 }
 0x1f7   : > { %2636 = vmatpush3.bf16.msra.mxu1 %v3035_v60  ;;  %2758 = vmatpush3.bf16.msra.mxu0 %v3036_v61 }
 0x1f8   : > { %2637 = vmatprep.subr.bf16.mxu1 %v3037_v62  ;;  %2759 = vmatprep.subr.bf16.mxu0 %v3272_v56 }
 0x1fb   : > { %2638 = vmatpush3.bf16.msra.mxu1 %v3038_v63  ;;  %2760 = vmatpush3.bf16.msra.mxu0 %v3039_v0 }
 0x1fc   : > { %2639 = vmatprep.subr.bf16.mxu1 %v3040_v1  ;;  %2761 = vmatprep.subr.bf16.mxu0 %v3272_v56 }
 0x1ff   : > { %2640 = vmatpush3.bf16.msra.mxu1 %v3041_v2  ;;  %2762 = vmatpush3.bf16.msra.mxu0 %v3042_v3 }
 0x200   : > { %2641 = vmatprep.subr.bf16.mxu1 %v3043_v4  ;;  %2763 = vmatprep.subr.bf16.mxu0 %v3272_v56  ;;  %v2470_v4 = vld [vmem:[%s3706_s4 + $0x2] ss:$0 sm:$0xff] }
 0x203   : > { %2642 = vmatpush3.bf16.msra.mxu1 %v3044_v5  ;;  %2764 = vmatpush3.bf16.msra.mxu0 %v3045_v6 }
 0x204   : > { %2643 = vmatprep.subr.bf16.mxu1 %v3046_v7  ;;  %2765 = vmatprep.subr.bf16.mxu0 %v3272_v56 }
 0x207   : > { %2644 = vmatpush3.bf16.msra.mxu1 %v3047_v8  ;;  %2766 = vmatpush3.bf16.msra.mxu0 %v3048_v9 }
 0x208   : > { %2771 = vmatprep.subr.bf16.mxu0 %v3272_v56  ;;  %2660 = vmatprep.subr.bf16.mxu1 %v3049_v14 }
 0x20a   : > { %2499 = vmatmul.mubr.msk.bf16.vlgmr.msra.gmra.mrb[16].mxu1 %vm3533_vm1, %v2498_v12  ;;  %2768 = vmatmul.mubr.msk.bf16.vlgmr.msra.gmra.mrb[12].mxu0 %vm3557_vm4, %v2503_v13 }
 0x20b   : > { %2787 = vmatprep.mubr.msk.bf16.mxu0 %vm3273_vm2, %v3272_v56  ;;  %2661 = vmatpush3.bf16.msra.mxu1 %v3050_v36 }
 0x20c   : > { %2662 = vmatprep.subr.bf16.mxu1 %v3051_v15  ;;  %2772 = vmatpush3.bf16.msra.mxu0 %v3065_v28 }
 0x20d   : > { %2773 = vmatprep.subr.bf16.mxu0 %v3272_v56 }
 0x20f   : > { %2663 = vmatpush3.bf16.msra.mxu1 %v3052_v17 }
 0x210   : > { %2664 = vmatprep.subr.bf16.mxu1 %v3053_v18  ;;  %2774 = vmatpush3.bf16.msra.mxu0 %v3066_v29 }
 0x211   : > { %2775 = vmatprep.subr.bf16.mxu0 %v3272_v56 }
 0x213   : > { %2665 = vmatpush3.bf16.msra.mxu1 %v3054_v19 }
 0x214   : > { %2666 = vmatprep.subr.bf16.mxu1 %v3055_v20  ;;  %2776 = vmatpush3.bf16.msra.mxu0 %v3067_v30 }
 0x215   : > { %2777 = vmatprep.subr.bf16.mxu0 %v3272_v56 }
 0x217   : > { %2667 = vmatpush3.bf16.msra.mxu1 %v3056_v57 }
 0x218   : > { %2668 = vmatprep.subr.bf16.mxu1 %v3057_v16  ;;  %2778 = vmatpush3.bf16.msra.mxu0 %v3068_v31 }
 0x219   : > { %2779 = vmatprep.subr.bf16.mxu0 %v3272_v56 }
 0x21b   : > { %2669 = vmatpush3.bf16.msra.mxu1 %v3058_v21 }
 0x21c   : > { %2670 = vmatprep.subr.bf16.mxu1 %v3059_v22  ;;  %2780 = vmatpush3.bf16.msra.mxu0 %v3069_v32  ;;  %v2529_v22 = vld [vmem:[%s3708_s6] ss:$0 sm:$0xff] }
 0x21d   : > { %2781 = vmatprep.subr.bf16.mxu0 %v3272_v56 }
 0x21f   : > { %2671 = vmatpush3.bf16.msra.mxu1 %v3060_v23 }
 0x220   : > { %2672 = vmatprep.subr.bf16.mxu1 %v3061_v24  ;;  %2782 = vmatpush3.bf16.msra.mxu0 %v3070_v33  ;;  %v3073_v24 = vld [vmem:[%s3509_s8] sm:$0xff]  ;;  %s3192_s8 = sshll.u32 %s3275_s15, 4  ;;  %s3193_s8 = int_to_ptr.vmem [resolvable:$false] %s3192_s8 }
 0x221   : > { %2783 = vmatprep.subr.bf16.mxu0 %v3272_v56  ;;  %s3194_s11 = scalar_lea.vmem %s3193_s8, 256  ;;  %p3195_p12 = scmp.lt.s32.totalorder %s3660_s1, %s3193_s8 }
 0x222   : > { %p3196_p2 = scmp.lt.s32.totalorder %s3194_s11, %s3188_s28 }
 0x223   : > { %2673 = vmatpush3.bf16.msra.mxu1 %v3062_v25 }
 0x224   : > { %2674 = vmatprep.subr.bf16.mxu1 %v3063_v26  ;;  %2784 = vmatpush3.bf16.msra.mxu0 %v3071_v34  ;;  %p3197_p1 = por %p3196_p2, %p3195_p12 }
 0x225   : > { %2785 = vmatprep.subr.bf16.mxu0 %v3272_v56  ;;  %v2434_v56 = vld [vmem:[%s3706_s4 + $0x1] ss:$0 sm:$0xff] }
 0x226   : > { %p3198_p4 = pnand %p3197_p1, %p3191_p7 }
 0x227   : > { %2675 = vmatpush3.bf16.msra.mxu1 %v3064_v27 }
 0x228   : > { %2786 = vmatpush3.bf16.msra.mxu0 %v3072_v35 }
 0x29d   : > { %v2583_v37 = vpop.f32.mrb[8].mxu1  ;;  %v1309_v38 = vpop.f32.mrb[4].mxu0 }
 0x29e   : > { %v2584_v40 = vpop.f32.mrb[9].mxu1  ;;  %v2729_v41 = vpop.f32.mrb[5].mxu0 }
 0x29f   : > { %v2585_v42 = vadd.f32 %v2584_v40, %v2583_v37  ;;  %v2586_v43 = vpop.f32.mrb[10].mxu1  ;;  %v1312_v44 = vpop.f32.mrb[6].mxu0 }
 0x2a0   : > { %v2587_v45 = vpop.f32.mrb[11].mxu1  ;;  %v2730_v46 = vpop.f32.mrb[7].mxu0 }
 0x2a1   : > { %v1270_v47 = vadd.f32 %v2585_v42, %v2398_v39 }
 0x2a3   : > { %v1310_v48 = vadd.f32 %v1309_v38, %v1270_v47 }
 0x2a5   : > { %v1315_v62 = vmax.f32 %v1310_v48, 0.0 }
 0x2a7   : > { %v1894_v1 = vpack.c.bf16 %v1315_v62, %v1315_v62 }
 0x2bd   : > { %v2614_v49 = vpop.f32.mrb[12].mxu1  ;;  %v1598_v50 = vpop.f32.mrb[8].mxu0 }
 0x2be   : > { %v2615_v51 = vpop.f32.mrb[13].mxu1  ;;  %v2749_v52 = vpop.f32.mrb[9].mxu0 }
 0x2bf   : > { %v2616_v53 = vadd.f32 %v2615_v51, %v2614_v49  ;;  %v2617_v54 = vpop.f32.mrb[14].mxu1  ;;  %v1601_v55 = vpop.f32.mrb[10].mxu0 }
 0x2c0   : > { %v2618_v58 = vpop.f32.mrb[15].mxu1  ;;  %v2750_v59 = vpop.f32.mrb[11].mxu0 }
 0x2c1   : > { %v1559_v60 = vadd.f32 %v2616_v53, %v2434_v56 }
 0x2c3   : > { %v1599_v61 = vadd.f32 %v1598_v50, %v1559_v60 }
 0x2c5   : > { %v1604_v63 = vmax.f32 %v1599_v61, 0.0 }
 0x2c7   : > { %v1895_v0 = vpack.c.bf16 %v1604_v63, %v1604_v63 }
 0x2c9   : > { %2121 = vmatprep.mubr.bf16.mxu1 %v1895_v0 }
 0x2ca   : > { %2122 = vmatmul.mubr.bf16.vlgmr.msra.gmra.mrb[20].mxu1 %v1894_v1 }
 0x2dd   : > { %v2645_v2 = vpop.f32.mrb[16].mxu1  ;;  %v1887_v3 = vpop.f32.mrb[12].mxu0 }
 0x2de   : > { %v2646_v5 = vpop.f32.mrb[17].mxu1  ;;  %v2769_v6 = vpop.f32.mrb[13].mxu0 }
 0x2df   : > { %v2647_v7 = vadd.f32 %v2646_v5, %v2645_v2  ;;  %v2648_v8 = vpop.f32.mrb[18].mxu1  ;;  %v1890_v9 = vpop.f32.mrb[14].mxu0 }
 0x2e0   : > { %v2649_v10 = vpop.f32.mrb[19].mxu1  ;;  %v2770_v11 = vpop.f32.mrb[15].mxu0 }
 0x2e1   : > { %v1848_v12 = vadd.f32 %v2647_v7, %v2470_v4 }
 0x2e3   : > { %v1888_v13 = vadd.f32 %v1887_v3, %v1848_v12 }
 0x2e5   : > { %v1893_v14 = vmax.f32 %v1888_v13, 0.0 }
 0x2e7   : > { %v1896_v36 = vpack.c.bf16 %v1893_v14, %v1893_v14 }
 0x2e9   : > { %2788 = vmatmul.mubr.bf16.vlgmr.msra.gmra.mrb[16].mxu0 %v1896_v36 }
 0x39d   : > { %v2676_v15 = vpop.f32.mrb[20].mxu1 }
 0x39e   : > { %v2677_v17 = vpop.f32.mrb[21].mxu1 }
 0x39f   : > { %v2678_v18 = vadd.f32 %v2677_v17, %v2676_v15  ;;  %v2679_v19 = vpop.f32.mrb[22].mxu1 }
 0x3a0   : > { %v2680_v20 = vpop.f32.mrb[23].mxu1 }
 0x3bc   : > { %v2163_v57 = vpop.f32.mrb[16].mxu0 }
 0x3bd   : > { %v2164_v16 = vadd.f32 %v2678_v18, %v2163_v57  ;;  %v2789_v21 = vpop.f32.mrb[17].mxu0 }
 0x3be   : > { %v2166_v23 = vpop.f32.mrb[18].mxu0 }
 0x3bf   : > { %v2169_v25 = vadd.f32 %v3073_v24, %v2164_v16  ;;  %v2790_v26 = vpop.f32.mrb[19].mxu0 }
 0x3c1   : > { %v2177_v27 = vadd.f32 %v2529_v22, %v2169_v25 }
 0x3c3   : > { %2178 = vst [vmem:[%s337_s10] sm:$0xff] %v2177_v27 }
 0x3c4   : > { %3201 = shalt.err (!%p3198_p4)
}
 0x3c5   : > { %s3202_s13 = scalar_lea.hbm %s3658_s29, 128  ;;  %s3206_s21 = scalar_lea.hbm %s3709_s7, 256 }
 0x3c6   : > { %p3203_p0 = scmp.ne.s32.totalorder %s3658_s29, %s3202_s13  ;;  %p3207_p8 = scmp.lt.u32.totalorder %s3658_s29, %s3709_s7 }
 0x3c7   : > { %p3208_p13 = scmp.lt.u32.totalorder %s3206_s21, %s3202_s13  ;;  %p3210_p10 = scmp.lt.u32.totalorder %s3202_s13, %s3658_s29 }
 0x3c8   : > { %p3204_p9 = pnand %p3203_p0, %p3458_p5 }
 0x3c9   : > { %p3209_p6 = por %p3208_p13, %p3207_p8 }
 0x3ca   : > { %p3205_p11 = pneg %p3204_p9 }
 0x3cb   : > { %p3211_p3 = por %p3210_p10, %p3209_p6 }
 0x3cd   : > { %p3212_p7 = pnand %p3211_p3, %p3205_p11 }
 0x3cf   : > { %3215 = shalt.err (!%p3212_p7)
}
 0x3d0   : > { %2811 = dma.vmem_to_hbm [thread:$0]  (%p3458_p5), %s3660_s1, 128, %s3658_s29, %s2180_s17  }
 0x3d1 PF: > { %s3737_s23 = sld [smem:[#allocation15_spill]]  ;;  %s2205_s10 = sand.u32 1, %s3250_s24  }
 0x3d2   : > { %p3739_p2 = scmp.ge.s32.totalorder %s3262_s27, 2  ;;  %s2206_s30 = scalar_lea.sflag [#allocation4], %s2205_s10 }
 0x3d7   : > { %p3738_p12 = scmp.ne.s32.totalorder %s3737_s23, 0 }
 0x3d9   : > { %p2828_p1 = pnand %p3739_p2, %p3738_p12 }
 0x3db   : > { %3245 = dma.done.wait (!%p2828_p1), %s2206_s30, 128  }
 0x3dc   : > { %3247 = vsyncadd (!%p2828_p1), %s2206_s30, 4294967168  ;;  %p22_p4 = scmp.ge.s32.totalorder %s3426_s18, 4   ;;  %s3740_s24 = smov %s3254_s25 }
 0x3dd   : > { %s3741_s25 = smov %s3258_s26  ;;  %s3742_s26 = smov %s3454_s12 }
 0x3de   : > { %s3743_s27 = smov %s3426_s18  ;;  %24 = sbr.rel (!%p22_p4) target bundleno = 9 (0x9), region = 109 }
 0x3e5   :  { %2211 = vsyncpa [#allocation3], 1 }
 0x3e6   :  { %2213 = vsyncpa [#allocation3 + $0x1], 1 }
 0x3e7   :  { %2214 = vsyncpa [#allocation6], 1 }
 0x3e8   :  { %2215 = vsyncpa [#allocation9], 1 }
 0x3e9   :  { %2216 = vsyncpa [#allocation4], 1 }
 0x3ea   :  { %2218 = vsyncpa [#allocation4 + $0x1], 1 }

</bundles_post_ra>
